<compile_context>
chip_gen: v7x
topology: tpu7x:2x2x1
jax: 0.10.0
libtpu: 0.0.40
codegen_flags: <defaults>
</compile_context>

<pallas_src>
import numpy as np
import jax
import jax.numpy as jnp
from jax.experimental import pallas as pl
from jax.experimental.pallas import tpu as pltpu


# --------------------------------------------------------------------------------------
# Geometry / layout constants
# --------------------------------------------------------------------------------------
H1 = W1 = 16            # conv1 spatial
M1 = H1 * W1            # 256 conv1 output rows (row = h*16 + w), 8-aligned
K1 = 16                 # conv1 packed contraction: 9 taps + ones(bias) col + pad

H2 = W2 = 8             # spatial after pool1
M2 = H2 * W2            # 64 conv2 output rows (row = h2*8 + w2)
WP2 = 10                # zero-padded pool1 grid side (8 + 2)
PP2_ROWS = 104          # 10*10 padded grid rows rounded up to a multiple of 8
K2 = 128                # conv2 packed contraction: 72 taps*ch + bias col (lane 72) + pad

H3 = W3 = 4             # spatial after pool2
C1 = 8                  # conv1 out channels
C2 = 16                 # conv2 out channels
LANES = 128             # lane-dense padded output width
FC_HID = 32
N_CLASS = 10
FLAT = 256              # 4*4*16 flatten size


# --------------------------------------------------------------------------------------
# Fused forward kernel
# --------------------------------------------------------------------------------------
def _fused_forward_kernel(lhs1_ref, w1_ref, w2_ref, wfc1_ref, bfc1_ref, wfc2_ref, bfc2_ref,
                          out_ref, c1, m2, lhs2, c2, fvec):
    f32 = jnp.float32

    # ---- conv1 (1->8, 3x3, pad=1) + ReLU: ONE MXU pass, M=256, K=16 --------------------
    # The 3x3 im2col (9 taps) and a ones column (folded bias) were packed into lhs1's K
    # dimension by the wrapper, so the whole layer is a single lane-dense matmul + ReLU.
    c1[...] = jnp.maximum(
        jnp.dot(lhs1_ref[...], w1_ref[...], preferred_element_type=f32), 0.0)

    # ---- maxpool1 (2x2, stride 2): stride-2 sublane slices + VPU max -------------------
    # c1 row = h*16 + w.  The pooled 8x8x8 grid is written into the zero-padded 10x10
    # conv2 input buffer m2 (only 8 lanes wide -> 16x less store traffic).
    m2[...] = jnp.zeros((PP2_ROWS, C1), f32)
    for ho in range(H2):
        r = ho * 2 * W1
        t00 = c1[pl.ds(r, W2, stride=2), :]            # h = 2ho,     w even
        t01 = c1[pl.ds(r + 1, W2, stride=2), :]        # h = 2ho,     w odd
        t10 = c1[pl.ds(r + W1, W2, stride=2), :]       # h = 2ho + 1, w even
        t11 = c1[pl.ds(r + W1 + 1, W2, stride=2), :]   # h = 2ho + 1, w odd
        pooled = jnp.maximum(jnp.maximum(t00, t01), jnp.maximum(t10, t11))   # (8, 128)
        m2[pl.ds((ho + 1) * WP2 + 1, W2), :] = pooled[:, 0:C1]

    # ---- conv2 (8->16, 3x3, pad=1) + ReLU: packed-K im2col + ONE MXU pass (M=64) -------
    # lhs2 lane t*8 + c holds padded_pool1[h2 + dh, w2 + dw, c]; lane 72 is the folded-bias
    # ones column; lanes 73..127 stay zero (w2 rows there are zero too).
    lane = jax.lax.broadcasted_iota(jnp.int32, (M2, K2), 1)
    lhs2[...] = jnp.where(lane == 9 * C1, 1.0, 0.0).astype(f32)
    for h2 in range(H2):
        for t in range(9):
            dh, dw = t // 3, t % 3
            lhs2[pl.ds(h2 * W2, W2), pl.ds(t * C1, C1)] = (
                m2[pl.ds((h2 + dh) * WP2 + dw, W2), :])
    c2[...] = jnp.maximum(
        jnp.dot(lhs2[...], w2_ref[...], preferred_element_type=f32), 0.0)

    # ---- maxpool2 (2x2, stride 2) + flatten ---------------------------------------------
    # Strided slices + max again; each 4x16 pooled block is written straight into the
    # lane-dense (1, 256) flatten vector (flat index = spatial*16 + channel; the
    # CHW->HWC permutation is folded into wfc1 at prep time).
    for ho in range(H3):
        r = ho * 2 * W2
        t00 = c2[pl.ds(r, W3, stride=2), :]
        t01 = c2[pl.ds(r + 1, W3, stride=2), :]
        t10 = c2[pl.ds(r + W2, W3, stride=2), :]
        t11 = c2[pl.ds(r + W2 + 1, W3, stride=2), :]
        pooled = jnp.maximum(jnp.maximum(t00, t01), jnp.maximum(t10, t11))   # (4, 128)
        for wo in range(W3):
            fvec[:, pl.ds((ho * W3 + wo) * C2, C2)] = pooled[wo:wo + 1, 0:C2]

    # ---- fc1 (256->32) + ReLU, fc2 (32->10); both padded to 128 output lanes ------------
    h = jnp.dot(fvec[...], wfc1_ref[...], preferred_element_type=f32) + bfc1_ref[...]
    h = jnp.maximum(h, 0.0)                        # lanes >= 32 are exactly zero
    out_ref[...] = jnp.dot(h, wfc2_ref[...], preferred_element_type=f32) + bfc2_ref[...]


# --------------------------------------------------------------------------------------
# Parameter init (torch-shaped) and one-time repacking for the kernel
# --------------------------------------------------------------------------------------
def init_params(key):
    ks = jax.random.split(key, 8)
    s = 0.1
    return dict(
        conv1_w=s * jax.random.normal(ks[0], (C1, 1, 3, 3), jnp.float32),     # OIHW
        conv1_b=s * jax.random.normal(ks[1], (C1,), jnp.float32),
        conv2_w=s * jax.random.normal(ks[2], (C2, C1, 3, 3), jnp.float32),
        conv2_b=s * jax.random.normal(ks[3], (C2,), jnp.float32),
        fc1_w=s * jax.random.normal(ks[4], (FC_HID, FLAT), jnp.float32),      # torch (out, in)
        fc1_b=s * jax.random.normal(ks[5], (FC_HID,), jnp.float32),
        fc2_w=s * jax.random.normal(ks[6], (N_CLASS, FC_HID), jnp.float32),
        fc2_b=s * jax.random.normal(ks[7], (FC_HID // FC_HID * N_CLASS,), jnp.float32),
    )


def prepare_params(p):
    """One-time (outside jit) repack: tap-packed conv weights with folded biases, lane
    padding to 128, and the CHW-flatten permutation folded into fc1's weight."""
    f32 = jnp.float32

    def pad_bias(b, n):
        return jnp.pad(b.astype(f32), (0, LANES - n)).reshape(1, LANES)

    # conv1: (co,1,kh,kw) -> rows 0..8 = tap t = kh*3+kw, row 9 = bias, rows 10..15 = 0.
    w1 = jnp.transpose(p["conv1_w"].astype(f32), (2, 3, 1, 0)).reshape(9, C1)
    w1 = jnp.concatenate(
        [w1, p["conv1_b"].astype(f32).reshape(1, C1), jnp.zeros((K1 - 10, C1), f32)], axis=0)
    w1 = jnp.pad(w1, ((0, 0), (0, LANES - C1)))                                # (16, 128)

    # conv2: (co,ci,kh,kw) -> row t*8 + ci, row 72 = bias, rows 73..127 = 0.
    w2 = jnp.transpose(p["conv2_w"].astype(f32), (2, 3, 1, 0)).reshape(9 * C1, C2)
    w2 = jnp.concatenate(
        [w2, p["conv2_b"].astype(f32).reshape(1, C2),
         jnp.zeros((K2 - 9 * C1 - 1, C2), f32)], axis=0)
    w2 = jnp.pad(w2, ((0, 0), (0, LANES - C2)))                                # (128, 128)

    # fc1: torch in-index = c*16 + s (CHW flatten); kernel's flatten order is s*16 + c.
    wfc1 = p["fc1_w"].astype(f32).reshape(FC_HID, C2, H3 * W3)      # (j, c, s)
    wfc1 = jnp.transpose(wfc1, (2, 1, 0)).reshape(FLAT, FC_HID)     # row = s*16 + c
    wfc1 = jnp.pad(wfc1, ((0, 0), (0, LANES - FC_HID)))

    # fc2: (out, in) -> (in_pad=128, out_pad=128); rows >= 32 multiply exact zeros.
    wfc2 = jnp.pad(p["fc2_w"].astype(f32).T,
                   ((0, LANES - FC_HID), (0, LANES - N_CLASS)))

    return dict(w1=w1, w2=w2,
                wfc1=wfc1, bfc1=pad_bias(p["fc1_b"], FC_HID),
                wfc2=wfc2, bfc2=pad_bias(p["fc2_b"], N_CLASS))


# --------------------------------------------------------------------------------------
# Forward wrappers
# --------------------------------------------------------------------------------------
@jax.jit
def model_forward(kp, x_chw):
    # x.unsqueeze(0).float(): forward takes a single un-batched CHW sample (C == 1).
    # Only cheap input prep (pad + conv1 im2col with a ones bias column) runs in XLA; all
    # layers execute inside ONE fused Pallas kernel with every activation in VMEM.
    x = x_chw.astype(jnp.float32)[0]                                  # (16, 16)
    xp = jnp.pad(x, 1)                                                # (18, 18)
    taps = [xp[dh:dh + H1, dw:dw + W1].reshape(M1, 1)
            for dh in range(3) for dw in range(3)]
    lhs1 = jnp.concatenate(
        taps + [jnp.ones((M1, 1), jnp.float32), jnp.zeros((M1, K1 - 10), jnp.float32)],
        axis=1)                                                       # (256, 16)

    inputs = (lhs1, kp["w1"], kp["w2"], kp["wfc1"], kp["bfc1"], kp["wfc2"], kp["bfc2"])

    out = pl.pallas_call(
        _fused_forward_kernel,
        out_shape=jax.ShapeDtypeStruct((1, LANES), jnp.float32),
        grid=(1,),
        in_specs=[pl.BlockSpec(a.shape, lambda i: (0, 0)) for a in inputs],
        out_specs=pl.BlockSpec((1, LANES), lambda i: (0, 0)),
        scratch_shapes=[
            pltpu.VMEM((M1, LANES), jnp.float32),      # c1:   conv1 output, row = h*16+w
            pltpu.VMEM((PP2_ROWS, C1), jnp.float32),   # m2:   zero-padded 10x10 pool1 grid
            pltpu.VMEM((M2, K2), jnp.float32),         # lhs2: conv2 packed-K im2col
            pltpu.VMEM((M2, LANES), jnp.float32),      # c2:   conv2 output, row = h2*8+w2
            pltpu.VMEM((1, FLAT), jnp.float32),        # fvec: lane-dense flatten vector
        ],
    )(*inputs)
    return out[:, :N_CLASS]


def reference_forward(params, x_chw):
    """Pure-JAX reference (full f32 precision) for correctness checking."""
    x = x_chw[None].astype(jnp.float32)                               # NCHW
    dn = ("NCHW", "OIHW", "NCHW")
    hp = jax.lax.Precision.HIGHEST
    y = jax.lax.conv_general_dilated(x, params["conv1_w"], (1, 1), ((1, 1), (1, 1)),
                                     dimension_numbers=dn, precision=hp)
    y = jax.nn.relu(y + params["conv1_b"][None, :, None, None])
    y = jax.lax.reduce_window(y, -jnp.inf, jax.lax.max, (1, 1, 2, 2), (1, 1, 2, 2), "VALID")
    y = jax.lax.conv_general_dilated(y, params["conv2_w"], (1, 1), ((1, 1), (1, 1)),
                                     dimension_numbers=dn, precision=hp)
    y = jax.nn.relu(y + params["conv2_b"][None, :, None, None])
    y = jax.lax.reduce_window(y, -jnp.inf, jax.lax.max, (1, 1, 2, 2), (1, 1, 2, 2), "VALID")
    f = y.reshape(1, -1)
    h = jax.nn.relu(jnp.dot(f, params["fc1_w"].T, precision=hp) + params["fc1_b"])
    return jnp.dot(h, params["fc2_w"].T, precision=hp) + params["fc2_b"]


if __name__ == "__main__":
    key = jax.random.PRNGKey(0)
    kx, kp_key = jax.random.split(key)
    # Module forward takes an un-batched CHW sample (it unsqueezes the batch dim itself).
    x = jax.random.normal(kx, (1, H1, W1), jnp.float32)
    params = init_params(kp_key)
    kernel_params = prepare_params(params)        # one-time repack, not on the hot path

    out = jax.block_until_ready(model_forward(kernel_params, x))
    assert out.shape == (1, N_CLASS) and out.dtype == jnp.float32

    ref = jax.block_until_ready(reference_forward(params, x))
    # All-f32 path: ~1e-4 tolerance (per review) catches any indexing/layout regression
    # while leaving headroom for multi-pass f32 MXU accumulation differences.
    if not np.allclose(np.asarray(out), np.asarray(ref), atol=2e-4, rtol=2e-4):
        raise AssertionError(
            "Pallas output mismatch, max|diff|="
            f"{np.max(np.abs(np.asarray(out) - np.asarray(ref)))}")

    print("KERNEL_OK")
</pallas_src>

<mosaic_0001>
module attributes {stable_mosaic.version = 11 : i64} {
  func.func @_fused_forward_kernel(%arg0: i32, %arg1: memref<256x16xf32, #tpu.memory_space<vmem>>, %arg2: memref<16x128xf32, #tpu.memory_space<vmem>>, %arg3: memref<128x128xf32, #tpu.memory_space<vmem>>, %arg4: memref<256x128xf32, #tpu.memory_space<vmem>>, %arg5: memref<1x128xf32, #tpu.memory_space<vmem>>, %arg6: memref<128x128xf32, #tpu.memory_space<vmem>>, %arg7: memref<1x128xf32, #tpu.memory_space<vmem>>, %arg8: memref<1x128xf32, #tpu.memory_space<vmem>>, %arg9: memref<256x128xf32, #tpu.memory_space<vmem>>, %arg10: memref<104x8xf32, #tpu.memory_space<vmem>>, %arg11: memref<64x128xf32, #tpu.memory_space<vmem>>, %arg12: memref<64x128xf32, #tpu.memory_space<vmem>>, %arg13: memref<1x256xf32, #tpu.memory_space<vmem>>) attributes {dimension_semantics = [#tpu.dimension_semantics<arbitrary>], iteration_bounds = array<i64: 1>, scalar_prefetch = 0 : i64, scratch_operands = 5 : i64, tpu.core_type = #tpu.core_type<tc>, window_params = [{pipeline_mode = #tpu.pipeline_mode<synchronous>, transform_indices = @transform_0, window_bounds = array<i64: 256, 16>}, {pipeline_mode = #tpu.pipeline_mode<synchronous>, transform_indices = @transform_1, window_bounds = array<i64: 16, 128>}, {pipeline_mode = #tpu.pipeline_mode<synchronous>, transform_indices = @transform_2, window_bounds = array<i64: 128, 128>}, {pipeline_mode = #tpu.pipeline_mode<synchronous>, transform_indices = @transform_3, window_bounds = array<i64: 256, 128>}, {pipeline_mode = #tpu.pipeline_mode<synchronous>, transform_indices = @transform_4, window_bounds = array<i64: 1, 128>}, {pipeline_mode = #tpu.pipeline_mode<synchronous>, transform_indices = @transform_5, window_bounds = array<i64: 128, 128>}, {pipeline_mode = #tpu.pipeline_mode<synchronous>, transform_indices = @transform_6, window_bounds = array<i64: 1, 128>}, {pipeline_mode = #tpu.pipeline_mode<synchronous>, transform_indices = @transform_7, window_bounds = array<i64: 1, 128>}]} {
    %c0 = arith.constant 0 : index
    %c0_0 = arith.constant 0 : index
    %0 = vector.load %arg1[%c0, %c0_0] : memref<256x16xf32, #tpu.memory_space<vmem>>, vector<256x16xf32>
    %c0_1 = arith.constant 0 : index
    %c0_2 = arith.constant 0 : index
    %1 = vector.load %arg2[%c0_1, %c0_2] : memref<16x128xf32, #tpu.memory_space<vmem>>, vector<16x128xf32>
    %cst = arith.constant dense<0.000000e+00> : vector<256x128xf32>
    %2 = tpu.matmul %0, %1, %cst {dimension_numbers = #tpu.dot_dimension_numbers<[1], [0], [0], [1], [0, 0, 1, 1], [], []>} : vector<256x16xf32>, vector<16x128xf32>, vector<256x128xf32> -> vector<256x128xf32>
    %cst_3 = arith.constant 0.000000e+00 : f32
    %3 = vector.broadcast %cst_3 : f32 to vector<256x128xf32>
    %4 = arith.maximumf %2, %3 : vector<256x128xf32>
    %c0_4 = arith.constant 0 : index
    %c0_5 = arith.constant 0 : index
    %5 = vector.load %arg9[%c0_4, %c0_5] : memref<256x128xf32, #tpu.memory_space<vmem>>, vector<256x128xf32>
    tpu.vector_store %arg9[%c0_4, %c0_5], %4 {strides = array<i32>} : memref<256x128xf32, #tpu.memory_space<vmem>>, vector<256x128xf32>,
    %cst_6 = arith.constant 0.000000e+00 : f32
    %6 = vector.broadcast %cst_6 : f32 to vector<104x8xf32>
    %c0_7 = arith.constant 0 : index
    %c0_8 = arith.constant 0 : index
    %7 = vector.load %arg10[%c0_7, %c0_8] : memref<104x8xf32, #tpu.memory_space<vmem>>, vector<104x8xf32>
    tpu.vector_store %arg10[%c0_7, %c0_8], %6 {strides = array<i32>} : memref<104x8xf32, #tpu.memory_space<vmem>>, vector<104x8xf32>,
    %c0_9 = arith.constant 0 : index
    %c0_10 = arith.constant 0 : index
    %8 = tpu.strided_load %arg9[%c0_9, %c0_10] {strides = array<i32: 2, 1>} : memref<256x128xf32, #tpu.memory_space<vmem>>, vector<8x128xf32>
    %c1 = arith.constant 1 : index
    %c0_11 = arith.constant 0 : index
    %9 = tpu.strided_load %arg9[%c1, %c0_11] {strides = array<i32: 2, 1>} : memref<256x128xf32, #tpu.memory_space<vmem>>, vector<8x128xf32>
    %c16 = arith.constant 16 : index
    %c0_12 = arith.constant 0 : index
    %10 = tpu.strided_load %arg9[%c16, %c0_12] {strides = array<i32: 2, 1>} : memref<256x128xf32, #tpu.memory_space<vmem>>, vector<8x128xf32>
    %c17 = arith.constant 17 : index
    %c0_13 = arith.constant 0 : index
    %11 = tpu.strided_load %arg9[%c17, %c0_13] {strides = array<i32: 2, 1>} : memref<256x128xf32, #tpu.memory_space<vmem>>, vector<8x128xf32>
    %12 = arith.maximumf %8, %9 : vector<8x128xf32>
    %13 = arith.maximumf %10, %11 : vector<8x128xf32>
    %14 = arith.maximumf %12, %13 : vector<8x128xf32>
    %15 = vector.extract_strided_slice %14 {offsets = [0, 0], sizes = [8, 8], strides = [1, 1]} : vector<8x128xf32> to vector<8x8xf32>
    %c11 = arith.constant 11 : index
    %c0_14 = arith.constant 0 : index
    %16 = vector.load %arg10[%c11, %c0_14] : memref<104x8xf32, #tpu.memory_space<vmem>>, vector<8x8xf32>
    tpu.vector_store %arg10[%c11, %c0_14], %15 {strides = array<i32>} : memref<104x8xf32, #tpu.memory_space<vmem>>, vector<8x8xf32>,
    %c32 = arith.constant 32 : index
    %c0_15 = arith.constant 0 : index
    %17 = tpu.strided_load %arg9[%c32, %c0_15] {strides = array<i32: 2, 1>} : memref<256x128xf32, #tpu.memory_space<vmem>>, vector<8x128xf32>
    %c33 = arith.constant 33 : index
    %c0_16 = arith.constant 0 : index
    %18 = tpu.strided_load %arg9[%c33, %c0_16] {strides = array<i32: 2, 1>} : memref<256x128xf32, #tpu.memory_space<vmem>>, vector<8x128xf32>
    %c48 = arith.constant 48 : index
    %c0_17 = arith.constant 0 : index
    %19 = tpu.strided_load %arg9[%c48, %c0_17] {strides = array<i32: 2, 1>} : memref<256x128xf32, #tpu.memory_space<vmem>>, vector<8x128xf32>
    %c49 = arith.constant 49 : index
    %c0_18 = arith.constant 0 : index
    %20 = tpu.strided_load %arg9[%c49, %c0_18] {strides = array<i32: 2, 1>} : memref<256x128xf32, #tpu.memory_space<vmem>>, vector<8x128xf32>
    %21 = arith.maximumf %17, %18 : vector<8x128xf32>
    %22 = arith.maximumf %19, %20 : vector<8x128xf32>
    %23 = arith.maximumf %21, %22 : vector<8x128xf32>
    %24 = vector.extract_strided_slice %23 {offsets = [0, 0], sizes = [8, 8], strides = [1, 1]} : vector<8x128xf32> to vector<8x8xf32>
    %c21 = arith.constant 21 : index
    %c0_19 = arith.constant 0 : index
    %25 = vector.load %arg10[%c21, %c0_19] : memref<104x8xf32, #tpu.memory_space<vmem>>, vector<8x8xf32>
    tpu.vector_store %arg10[%c21, %c0_19], %24 {strides = array<i32>} : memref<104x8xf32, #tpu.memory_space<vmem>>, vector<8x8xf32>,
    %c64 = arith.constant 64 : index
    %c0_20 = arith.constant 0 : index
    %26 = tpu.strided_load %arg9[%c64, %c0_20] {strides = array<i32: 2, 1>} : memref<256x128xf32, #tpu.memory_space<vmem>>, vector<8x128xf32>
    %c65 = arith.constant 65 : index
    %c0_21 = arith.constant 0 : index
    %27 = tpu.strided_load %arg9[%c65, %c0_21] {strides = array<i32: 2, 1>} : memref<256x128xf32, #tpu.memory_space<vmem>>, vector<8x128xf32>
    %c80 = arith.constant 80 : index
    %c0_22 = arith.constant 0 : index
    %28 = tpu.strided_load %arg9[%c80, %c0_22] {strides = array<i32: 2, 1>} : memref<256x128xf32, #tpu.memory_space<vmem>>, vector<8x128xf32>
    %c81 = arith.constant 81 : index
    %c0_23 = arith.constant 0 : index
    %29 = tpu.strided_load %arg9[%c81, %c0_23] {strides = array<i32: 2, 1>} : memref<256x128xf32, #tpu.memory_space<vmem>>, vector<8x128xf32>
    %30 = arith.maximumf %26, %27 : vector<8x128xf32>
    %31 = arith.maximumf %28, %29 : vector<8x128xf32>
    %32 = arith.maximumf %30, %31 : vector<8x128xf32>
    %33 = vector.extract_strided_slice %32 {offsets = [0, 0], sizes = [8, 8], strides = [1, 1]} : vector<8x128xf32> to vector<8x8xf32>
    %c31 = arith.constant 31 : index
    %c0_24 = arith.constant 0 : index
    %34 = vector.load %arg10[%c31, %c0_24] : memref<104x8xf32, #tpu.memory_space<vmem>>, vector<8x8xf32>
    tpu.vector_store %arg10[%c31, %c0_24], %33 {strides = array<i32>} : memref<104x8xf32, #tpu.memory_space<vmem>>, vector<8x8xf32>,
    %c96 = arith.constant 96 : index
    %c0_25 = arith.constant 0 : index
    %35 = tpu.strided_load %arg9[%c96, %c0_25] {strides = array<i32: 2, 1>} : memref<256x128xf32, #tpu.memory_space<vmem>>, vector<8x128xf32>
    %c97 = arith.constant 97 : index
    %c0_26 = arith.constant 0 : index
    %36 = tpu.strided_load %arg9[%c97, %c0_26] {strides = array<i32: 2, 1>} : memref<256x128xf32, #tpu.memory_space<vmem>>, vector<8x128xf32>
    %c112 = arith.constant 112 : index
    %c0_27 = arith.constant 0 : index
    %37 = tpu.strided_load %arg9[%c112, %c0_27] {strides = array<i32: 2, 1>} : memref<256x128xf32, #tpu.memory_space<vmem>>, vector<8x128xf32>
    %c113 = arith.constant 113 : index
    %c0_28 = arith.constant 0 : index
    %38 = tpu.strided_load %arg9[%c113, %c0_28] {strides = array<i32: 2, 1>} : memref<256x128xf32, #tpu.memory_space<vmem>>, vector<8x128xf32>
    %39 = arith.maximumf %35, %36 : vector<8x128xf32>
    %40 = arith.maximumf %37, %38 : vector<8x128xf32>
    %41 = arith.maximumf %39, %40 : vector<8x128xf32>
    %42 = vector.extract_strided_slice %41 {offsets = [0, 0], sizes = [8, 8], strides = [1, 1]} : vector<8x128xf32> to vector<8x8xf32>
    %c41 = arith.constant 41 : index
    %c0_29 = arith.constant 0 : index
    %43 = vector.load %arg10[%c41, %c0_29] : memref<104x8xf32, #tpu.memory_space<vmem>>, vector<8x8xf32>
    tpu.vector_store %arg10[%c41, %c0_29], %42 {strides = array<i32>} : memref<104x8xf32, #tpu.memory_space<vmem>>, vector<8x8xf32>,
    %c128 = arith.constant 128 : index
    %c0_30 = arith.constant 0 : index
    %44 = tpu.strided_load %arg9[%c128, %c0_30] {strides = array<i32: 2, 1>} : memref<256x128xf32, #tpu.memory_space<vmem>>, vector<8x128xf32>
    %c129 = arith.constant 129 : index
    %c0_31 = arith.constant 0 : index
    %45 = tpu.strided_load %arg9[%c129, %c0_31] {strides = array<i32: 2, 1>} : memref<256x128xf32, #tpu.memory_space<vmem>>, vector<8x128xf32>
    %c144 = arith.constant 144 : index
    %c0_32 = arith.constant 0 : index
    %46 = tpu.strided_load %arg9[%c144, %c0_32] {strides = array<i32: 2, 1>} : memref<256x128xf32, #tpu.memory_space<vmem>>, vector<8x128xf32>
    %c145 = arith.constant 145 : index
    %c0_33 = arith.constant 0 : index
    %47 = tpu.strided_load %arg9[%c145, %c0_33] {strides = array<i32: 2, 1>} : memref<256x128xf32, #tpu.memory_space<vmem>>, vector<8x128xf32>
    %48 = arith.maximumf %44, %45 : vector<8x128xf32>
    %49 = arith.maximumf %46, %47 : vector<8x128xf32>
    %50 = arith.maximumf %48, %49 : vector<8x128xf32>
    %51 = vector.extract_strided_slice %50 {offsets = [0, 0], sizes = [8, 8], strides = [1, 1]} : vector<8x128xf32> to vector<8x8xf32>
    %c51 = arith.constant 51 : index
    %c0_34 = arith.constant 0 : index
    %52 = vector.load %arg10[%c51, %c0_34] : memref<104x8xf32, #tpu.memory_space<vmem>>, vector<8x8xf32>
    tpu.vector_store %arg10[%c51, %c0_34], %51 {strides = array<i32>} : memref<104x8xf32, #tpu.memory_space<vmem>>, vector<8x8xf32>,
    %c160 = arith.constant 160 : index
    %c0_35 = arith.constant 0 : index
    %53 = tpu.strided_load %arg9[%c160, %c0_35] {strides = array<i32: 2, 1>} : memref<256x128xf32, #tpu.memory_space<vmem>>, vector<8x128xf32>
    %c161 = arith.constant 161 : index
    %c0_36 = arith.constant 0 : index
    %54 = tpu.strided_load %arg9[%c161, %c0_36] {strides = array<i32: 2, 1>} : memref<256x128xf32, #tpu.memory_space<vmem>>, vector<8x128xf32>
    %c176 = arith.constant 176 : index
    %c0_37 = arith.constant 0 : index
    %55 = tpu.strided_load %arg9[%c176, %c0_37] {strides = array<i32: 2, 1>} : memref<256x128xf32, #tpu.memory_space<vmem>>, vector<8x128xf32>
    %c177 = arith.constant 177 : index
    %c0_38 = arith.constant 0 : index
    %56 = tpu.strided_load %arg9[%c177, %c0_38] {strides = array<i32: 2, 1>} : memref<256x128xf32, #tpu.memory_space<vmem>>, vector<8x128xf32>
    %57 = arith.maximumf %53, %54 : vector<8x128xf32>
    %58 = arith.maximumf %55, %56 : vector<8x128xf32>
    %59 = arith.maximumf %57, %58 : vector<8x128xf32>
    %60 = vector.extract_strided_slice %59 {offsets = [0, 0], sizes = [8, 8], strides = [1, 1]} : vector<8x128xf32> to vector<8x8xf32>
    %c61 = arith.constant 61 : index
    %c0_39 = arith.constant 0 : index
    %61 = vector.load %arg10[%c61, %c0_39] : memref<104x8xf32, #tpu.memory_space<vmem>>, vector<8x8xf32>
    tpu.vector_store %arg10[%c61, %c0_39], %60 {strides = array<i32>} : memref<104x8xf32, #tpu.memory_space<vmem>>, vector<8x8xf32>,
    %c192 = arith.constant 192 : index
    %c0_40 = arith.constant 0 : index
    %62 = tpu.strided_load %arg9[%c192, %c0_40] {strides = array<i32: 2, 1>} : memref<256x128xf32, #tpu.memory_space<vmem>>, vector<8x128xf32>
    %c193 = arith.constant 193 : index
    %c0_41 = arith.constant 0 : index
    %63 = tpu.strided_load %arg9[%c193, %c0_41] {strides = array<i32: 2, 1>} : memref<256x128xf32, #tpu.memory_space<vmem>>, vector<8x128xf32>
    %c208 = arith.constant 208 : index
    %c0_42 = arith.constant 0 : index
    %64 = tpu.strided_load %arg9[%c208, %c0_42] {strides = array<i32: 2, 1>} : memref<256x128xf32, #tpu.memory_space<vmem>>, vector<8x128xf32>
    %c209 = arith.constant 209 : index
    %c0_43 = arith.constant 0 : index
    %65 = tpu.strided_load %arg9[%c209, %c0_43] {strides = array<i32: 2, 1>} : memref<256x128xf32, #tpu.memory_space<vmem>>, vector<8x128xf32>
    %66 = arith.maximumf %62, %63 : vector<8x128xf32>
    %67 = arith.maximumf %64, %65 : vector<8x128xf32>
    %68 = arith.maximumf %66, %67 : vector<8x128xf32>
    %69 = vector.extract_strided_slice %68 {offsets = [0, 0], sizes = [8, 8], strides = [1, 1]} : vector<8x128xf32> to vector<8x8xf32>
    %c71 = arith.constant 71 : index
    %c0_44 = arith.constant 0 : index
    %70 = vector.load %arg10[%c71, %c0_44] : memref<104x8xf32, #tpu.memory_space<vmem>>, vector<8x8xf32>
    tpu.vector_store %arg10[%c71, %c0_44], %69 {strides = array<i32>} : memref<104x8xf32, #tpu.memory_space<vmem>>, vector<8x8xf32>,
    %c224 = arith.constant 224 : index
    %c0_45 = arith.constant 0 : index
    %71 = tpu.strided_load %arg9[%c224, %c0_45] {strides = array<i32: 2, 1>} : memref<256x128xf32, #tpu.memory_space<vmem>>, vector<8x128xf32>
    %c225 = arith.constant 225 : index
    %c0_46 = arith.constant 0 : index
    %72 = tpu.strided_load %arg9[%c225, %c0_46] {strides = array<i32: 2, 1>} : memref<256x128xf32, #tpu.memory_space<vmem>>, vector<8x128xf32>
    %c240 = arith.constant 240 : index
    %c0_47 = arith.constant 0 : index
    %73 = tpu.strided_load %arg9[%c240, %c0_47] {strides = array<i32: 2, 1>} : memref<256x128xf32, #tpu.memory_space<vmem>>, vector<8x128xf32>
    %c241 = arith.constant 241 : index
    %c0_48 = arith.constant 0 : index
    %74 = tpu.strided_load %arg9[%c241, %c0_48] {strides = array<i32: 2, 1>} : memref<256x128xf32, #tpu.memory_space<vmem>>, vector<8x128xf32>
    %75 = arith.maximumf %71, %72 : vector<8x128xf32>
    %76 = arith.maximumf %73, %74 : vector<8x128xf32>
    %77 = arith.maximumf %75, %76 : vector<8x128xf32>
    %78 = vector.extract_strided_slice %77 {offsets = [0, 0], sizes = [8, 8], strides = [1, 1]} : vector<8x128xf32> to vector<8x8xf32>
    %c81_49 = arith.constant 81 : index
    %c0_50 = arith.constant 0 : index
    %79 = vector.load %arg10[%c81_49, %c0_50] : memref<104x8xf32, #tpu.memory_space<vmem>>, vector<8x8xf32>
    tpu.vector_store %arg10[%c81_49, %c0_50], %78 {strides = array<i32>} : memref<104x8xf32, #tpu.memory_space<vmem>>, vector<8x8xf32>,
    %80 = tpu.iota {dimensions = array<i32: 1>} : vector<64x128xi32>
    %c72_i32 = arith.constant 72 : i32
    %81 = vector.broadcast %c72_i32 : i32 to vector<64x128xi32>
    %82 = arith.cmpi eq, %80, %81 : vector<64x128xi32>
    %cst_51 = arith.constant 1.000000e+00 : f32
    %cst_52 = arith.constant 0.000000e+00 : f32
    %83 = vector.broadcast %cst_51 : f32 to vector<64x128xf32>
    %84 = vector.broadcast %cst_52 : f32 to vector<64x128xf32>
    %85 = arith.select %82, %83, %84 : vector<64x128xi1>, vector<64x128xf32>
    %c0_53 = arith.constant 0 : index
    %c0_54 = arith.constant 0 : index
    %86 = vector.load %arg11[%c0_53, %c0_54] : memref<64x128xf32, #tpu.memory_space<vmem>>, vector<64x128xf32>
    tpu.vector_store %arg11[%c0_53, %c0_54], %85 {strides = array<i32>} : memref<64x128xf32, #tpu.memory_space<vmem>>, vector<64x128xf32>,
    %c0_55 = arith.constant 0 : index
    %c0_56 = arith.constant 0 : index
    %87 = vector.load %arg10[%c0_55, %c0_56] : memref<104x8xf32, #tpu.memory_space<vmem>>, vector<8x8xf32>
    %c0_57 = arith.constant 0 : index
    %c0_58 = arith.constant 0 : index
    %88 = vector.load %arg11[%c0_57, %c0_58] : memref<64x128xf32, #tpu.memory_space<vmem>>, vector<8x8xf32>
    tpu.vector_store %arg11[%c0_57, %c0_58], %87 {strides = array<i32>} : memref<64x128xf32, #tpu.memory_space<vmem>>, vector<8x8xf32>,
    %c1_59 = arith.constant 1 : index
    %c0_60 = arith.constant 0 : index
    %89 = vector.load %arg10[%c1_59, %c0_60] : memref<104x8xf32, #tpu.memory_space<vmem>>, vector<8x8xf32>
    %c0_61 = arith.constant 0 : index
    %c8 = arith.constant 8 : index
    %90 = vector.load %arg11[%c0_61, %c8] : memref<64x128xf32, #tpu.memory_space<vmem>>, vector<8x8xf32>
    tpu.vector_store %arg11[%c0_61, %c8], %89 {strides = array<i32>} : memref<64x128xf32, #tpu.memory_space<vmem>>, vector<8x8xf32>,
    %c2 = arith.constant 2 : index
    %c0_62 = arith.constant 0 : index
    %91 = vector.load %arg10[%c2, %c0_62] : memref<104x8xf32, #tpu.memory_space<vmem>>, vector<8x8xf32>
    %c0_63 = arith.constant 0 : index
    %c16_64 = arith.constant 16 : index
    %92 = vector.load %arg11[%c0_63, %c16_64] : memref<64x128xf32, #tpu.memory_space<vmem>>, vector<8x8xf32>
    tpu.vector_store %arg11[%c0_63, %c16_64], %91 {strides = array<i32>} : memref<64x128xf32, #tpu.memory_space<vmem>>, vector<8x8xf32>,
    %c10 = arith.constant 10 : index
    %c0_65 = arith.constant 0 : index
    %93 = vector.load %arg10[%c10, %c0_65] : memref<104x8xf32, #tpu.memory_space<vmem>>, vector<8x8xf32>
    %c0_66 = arith.constant 0 : index
    %c24 = arith.constant 24 : index
    %94 = vector.load %arg11[%c0_66, %c24] : memref<64x128xf32, #tpu.memory_space<vmem>>, vector<8x8xf32>
    tpu.vector_store %arg11[%c0_66, %c24], %93 {strides = array<i32>} : memref<64x128xf32, #tpu.memory_space<vmem>>, vector<8x8xf32>,
    %c11_67 = arith.constant 11 : index
    %c0_68 = arith.constant 0 : index
    %95 = vector.load %arg10[%c11_67, %c0_68] : memref<104x8xf32, #tpu.memory_space<vmem>>, vector<8x8xf32>
    %c0_69 = arith.constant 0 : index
    %c32_70 = arith.constant 32 : index
    %96 = vector.load %arg11[%c0_69, %c32_70] : memref<64x128xf32, #tpu.memory_space<vmem>>, vector<8x8xf32>
    tpu.vector_store %arg11[%c0_69, %c32_70], %95 {strides = array<i32>} : memref<64x128xf32, #tpu.memory_space<vmem>>, vector<8x8xf32>,
    %c12 = arith.constant 12 : index
    %c0_71 = arith.constant 0 : index
    %97 = vector.load %arg10[%c12, %c0_71] : memref<104x8xf32, #tpu.memory_space<vmem>>, vector<8x8xf32>
    %c0_72 = arith.constant 0 : index
    %c40 = arith.constant 40 : index
    %98 = vector.load %arg11[%c0_72, %c40] : memref<64x128xf32, #tpu.memory_space<vmem>>, vector<8x8xf32>
    tpu.vector_store %arg11[%c0_72, %c40], %97 {strides = array<i32>} : memref<64x128xf32, #tpu.memory_space<vmem>>, vector<8x8xf32>,
    %c20 = arith.constant 20 : index
    %c0_73 = arith.constant 0 : index
    %99 = vector.load %arg10[%c20, %c0_73] : memref<104x8xf32, #tpu.memory_space<vmem>>, vector<8x8xf32>
    %c0_74 = arith.constant 0 : index
    %c48_75 = arith.constant 48 : index
    %100 = vector.load %arg11[%c0_74, %c48_75] : memref<64x128xf32, #tpu.memory_space<vmem>>, vector<8x8xf32>
    tpu.vector_store %arg11[%c0_74, %c48_75], %99 {strides = array<i32>} : memref<64x128xf32, #tpu.memory_space<vmem>>, vector<8x8xf32>,
    %c21_76 = arith.constant 21 : index
    %c0_77 = arith.constant 0 : index
    %101 = vector.load %arg10[%c21_76, %c0_77] : memref<104x8xf32, #tpu.memory_space<vmem>>, vector<8x8xf32>
    %c0_78 = arith.constant 0 : index
    %c56 = arith.constant 56 : index
    %102 = vector.load %arg11[%c0_78, %c56] : memref<64x128xf32, #tpu.memory_space<vmem>>, vector<8x8xf32>
    tpu.vector_store %arg11[%c0_78, %c56], %101 {strides = array<i32>} : memref<64x128xf32, #tpu.memory_space<vmem>>, vector<8x8xf32>,
    %c22 = arith.constant 22 : index
    %c0_79 = arith.constant 0 : index
    %103 = vector.load %arg10[%c22, %c0_79] : memref<104x8xf32, #tpu.memory_space<vmem>>, vector<8x8xf32>
    %c0_80 = arith.constant 0 : index
    %c64_81 = arith.constant 64 : index
    %104 = vector.load %arg11[%c0_80, %c64_81] : memref<64x128xf32, #tpu.memory_space<vmem>>, vector<8x8xf32>
    tpu.vector_store %arg11[%c0_80, %c64_81], %103 {strides = array<i32>} : memref<64x128xf32, #tpu.memory_space<vmem>>, vector<8x8xf32>,
    %c10_82 = arith.constant 10 : index
    %c0_83 = arith.constant 0 : index
    %105 = vector.load %arg10[%c10_82, %c0_83] : memref<104x8xf32, #tpu.memory_space<vmem>>, vector<8x8xf32>
    %c8_84 = arith.constant 8 : index
    %c0_85 = arith.constant 0 : index
    %106 = vector.load %arg11[%c8_84, %c0_85] : memref<64x128xf32, #tpu.memory_space<vmem>>, vector<8x8xf32>
    tpu.vector_store %arg11[%c8_84, %c0_85], %105 {strides = array<i32>} : memref<64x128xf32, #tpu.memory_space<vmem>>, vector<8x8xf32>,
    %c11_86 = arith.constant 11 : index
    %c0_87 = arith.constant 0 : index
    %107 = vector.load %arg10[%c11_86, %c0_87] : memref<104x8xf32, #tpu.memory_space<vmem>>, vector<8x8xf32>
    %c8_88 = arith.constant 8 : index
    %c8_89 = arith.constant 8 : index
    %108 = vector.load %arg11[%c8_88, %c8_89] : memref<64x128xf32, #tpu.memory_space<vmem>>, vector<8x8xf32>
    tpu.vector_store %arg11[%c8_88, %c8_89], %107 {strides = array<i32>} : memref<64x128xf32, #tpu.memory_space<vmem>>, vector<8x8xf32>,
    %c12_90 = arith.constant 12 : index
    %c0_91 = arith.constant 0 : index
    %109 = vector.load %arg10[%c12_90, %c0_91] : memref<104x8xf32, #tpu.memory_space<vmem>>, vector<8x8xf32>
    %c8_92 = arith.constant 8 : index
    %c16_93 = arith.constant 16 : index
    %110 = vector.load %arg11[%c8_92, %c16_93] : memref<64x128xf32, #tpu.memory_space<vmem>>, vector<8x8xf32>
    tpu.vector_store %arg11[%c8_92, %c16_93], %109 {strides = array<i32>} : memref<64x128xf32, #tpu.memory_space<vmem>>, vector<8x8xf32>,
    %c20_94 = arith.constant 20 : index
    %c0_95 = arith.constant 0 : index
    %111 = vector.load %arg10[%c20_94, %c0_95] : memref<104x8xf32, #tpu.memory_space<vmem>>, vector<8x8xf32>
    %c8_96 = arith.constant 8 : index
    %c24_97 = arith.constant 24 : index
    %112 = vector.load %arg11[%c8_96, %c24_97] : memref<64x128xf32, #tpu.memory_space<vmem>>, vector<8x8xf32>
    tpu.vector_store %arg11[%c8_96, %c24_97], %111 {strides = array<i32>} : memref<64x128xf32, #tpu.memory_space<vmem>>, vector<8x8xf32>,
    %c21_98 = arith.constant 21 : index
    %c0_99 = arith.constant 0 : index
    %113 = vector.load %arg10[%c21_98, %c0_99] : memref<104x8xf32, #tpu.memory_space<vmem>>, vector<8x8xf32>
    %c8_100 = arith.constant 8 : index
    %c32_101 = arith.constant 32 : index
    %114 = vector.load %arg11[%c8_100, %c32_101] : memref<64x128xf32, #tpu.memory_space<vmem>>, vector<8x8xf32>
    tpu.vector_store %arg11[%c8_100, %c32_101], %113 {strides = array<i32>} : memref<64x128xf32, #tpu.memory_space<vmem>>, vector<8x8xf32>,
    %c22_102 = arith.constant 22 : index
    %c0_103 = arith.constant 0 : index
    %115 = vector.load %arg10[%c22_102, %c0_103] : memref<104x8xf32, #tpu.memory_space<vmem>>, vector<8x8xf32>
    %c8_104 = arith.constant 8 : index
    %c40_105 = arith.constant 40 : index
    %116 = vector.load %arg11[%c8_104, %c40_105] : memref<64x128xf32, #tpu.memory_space<vmem>>, vector<8x8xf32>
    tpu.vector_store %arg11[%c8_104, %c40_105], %115 {strides = array<i32>} : memref<64x128xf32, #tpu.memory_space<vmem>>, vector<8x8xf32>,
    %c30 = arith.constant 30 : index
    %c0_106 = arith.constant 0 : index
    %117 = vector.load %arg10[%c30, %c0_106] : memref<104x8xf32, #tpu.memory_space<vmem>>, vector<8x8xf32>
    %c8_107 = arith.constant 8 : index
    %c48_108 = arith.constant 48 : index
    %118 = vector.load %arg11[%c8_107, %c48_108] : memref<64x128xf32, #tpu.memory_space<vmem>>, vector<8x8xf32>
    tpu.vector_store %arg11[%c8_107, %c48_108], %117 {strides = array<i32>} : memref<64x128xf32, #tpu.memory_space<vmem>>, vector<8x8xf32>,
    %c31_109 = arith.constant 31 : index
    %c0_110 = arith.constant 0 : index
    %119 = vector.load %arg10[%c31_109, %c0_110] : memref<104x8xf32, #tpu.memory_space<vmem>>, vector<8x8xf32>
    %c8_111 = arith.constant 8 : index
    %c56_112 = arith.constant 56 : index
    %120 = vector.load %arg11[%c8_111, %c56_112] : memref<64x128xf32, #tpu.memory_space<vmem>>, vector<8x8xf32>
    tpu.vector_store %arg11[%c8_111, %c56_112], %119 {strides = array<i32>} : memref<64x128xf32, #tpu.memory_space<vmem>>, vector<8x8xf32>,
    %c32_113 = arith.constant 32 : index
    %c0_114 = arith.constant 0 : index
    %121 = vector.load %arg10[%c32_113, %c0_114] : memref<104x8xf32, #tpu.memory_space<vmem>>, vector<8x8xf32>
    %c8_115 = arith.constant 8 : index
    %c64_116 = arith.constant 64 : index
    %122 = vector.load %arg11[%c8_115, %c64_116] : memref<64x128xf32, #tpu.memory_space<vmem>>, vector<8x8xf32>
    tpu.vector_store %arg11[%c8_115, %c64_116], %121 {strides = array<i32>} : memref<64x128xf32, #tpu.memory_space<vmem>>, vector<8x8xf32>,
    %c20_117 = arith.constant 20 : index
    %c0_118 = arith.constant 0 : index
    %123 = vector.load %arg10[%c20_117, %c0_118] : memref<104x8xf32, #tpu.memory_space<vmem>>, vector<8x8xf32>
    %c16_119 = arith.constant 16 : index
    %c0_120 = arith.constant 0 : index
    %124 = vector.load %arg11[%c16_119, %c0_120] : memref<64x128xf32, #tpu.memory_space<vmem>>, vector<8x8xf32>
    tpu.vector_store %arg11[%c16_119, %c0_120], %123 {strides = array<i32>} : memref<64x128xf32, #tpu.memory_space<vmem>>, vector<8x8xf32>,
    %c21_121 = arith.constant 21 : index
    %c0_122 = arith.constant 0 : index
    %125 = vector.load %arg10[%c21_121, %c0_122] : memref<104x8xf32, #tpu.memory_space<vmem>>, vector<8x8xf32>
    %c16_123 = arith.constant 16 : index
    %c8_124 = arith.constant 8 : index
    %126 = vector.load %arg11[%c16_123, %c8_124] : memref<64x128xf32, #tpu.memory_space<vmem>>, vector<8x8xf32>
    tpu.vector_store %arg11[%c16_123, %c8_124], %125 {strides = array<i32>} : memref<64x128xf32, #tpu.memory_space<vmem>>, vector<8x8xf32>,
    %c22_125 = arith.constant 22 : index
    %c0_126 = arith.constant 0 : index
    %127 = vector.load %arg10[%c22_125, %c0_126] : memref<104x8xf32, #tpu.memory_space<vmem>>, vector<8x8xf32>
    %c16_127 = arith.constant 16 : index
    %c16_128 = arith.constant 16 : index
    %128 = vector.load %arg11[%c16_127, %c16_128] : memref<64x128xf32, #tpu.memory_space<vmem>>, vector<8x8xf32>
    tpu.vector_store %arg11[%c16_127, %c16_128], %127 {strides = array<i32>} : memref<64x128xf32, #tpu.memory_space<vmem>>, vector<8x8xf32>,
    %c30_129 = arith.constant 30 : index
    %c0_130 = arith.constant 0 : index
    %129 = vector.load %arg10[%c30_129, %c0_130] : memref<104x8xf32, #tpu.memory_space<vmem>>, vector<8x8xf32>
    %c16_131 = arith.constant 16 : index
    %c24_132 = arith.constant 24 : index
    %130 = vector.load %arg11[%c16_131, %c24_132] : memref<64x128xf32, #tpu.memory_space<vmem>>, vector<8x8xf32>
    tpu.vector_store %arg11[%c16_131, %c24_132], %129 {strides = array<i32>} : memref<64x128xf32, #tpu.memory_space<vmem>>, vector<8x8xf32>,
    %c31_133 = arith.constant 31 : index
    %c0_134 = arith.constant 0 : index
    %131 = vector.load %arg10[%c31_133, %c0_134] : memref<104x8xf32, #tpu.memory_space<vmem>>, vector<8x8xf32>
    %c16_135 = arith.constant 16 : index
    %c32_136 = arith.constant 32 : index
    %132 = vector.load %arg11[%c16_135, %c32_136] : memref<64x128xf32, #tpu.memory_space<vmem>>, vector<8x8xf32>
    tpu.vector_store %arg11[%c16_135, %c32_136], %131 {strides = array<i32>} : memref<64x128xf32, #tpu.memory_space<vmem>>, vector<8x8xf32>,
    %c32_137 = arith.constant 32 : index
    %c0_138 = arith.constant 0 : index
    %133 = vector.load %arg10[%c32_137, %c0_138] : memref<104x8xf32, #tpu.memory_space<vmem>>, vector<8x8xf32>
    %c16_139 = arith.constant 16 : index
    %c40_140 = arith.constant 40 : index
    %134 = vector.load %arg11[%c16_139, %c40_140] : memref<64x128xf32, #tpu.memory_space<vmem>>, vector<8x8xf32>
    tpu.vector_store %arg11[%c16_139, %c40_140], %133 {strides = array<i32>} : memref<64x128xf32, #tpu.memory_space<vmem>>, vector<8x8xf32>,
    %c40_141 = arith.constant 40 : index
    %c0_142 = arith.constant 0 : index
    %135 = vector.load %arg10[%c40_141, %c0_142] : memref<104x8xf32, #tpu.memory_space<vmem>>, vector<8x8xf32>
    %c16_143 = arith.constant 16 : index
    %c48_144 = arith.constant 48 : index
    %136 = vector.load %arg11[%c16_143, %c48_144] : memref<64x128xf32, #tpu.memory_space<vmem>>, vector<8x8xf32>
    tpu.vector_store %arg11[%c16_143, %c48_144], %135 {strides = array<i32>} : memref<64x128xf32, #tpu.memory_space<vmem>>, vector<8x8xf32>,
    %c41_145 = arith.constant 41 : index
    %c0_146 = arith.constant 0 : index
    %137 = vector.load %arg10[%c41_145, %c0_146] : memref<104x8xf32, #tpu.memory_space<vmem>>, vector<8x8xf32>
    %c16_147 = arith.constant 16 : index
    %c56_148 = arith.constant 56 : index
    %138 = vector.load %arg11[%c16_147, %c56_148] : memref<64x128xf32, #tpu.memory_space<vmem>>, vector<8x8xf32>
    tpu.vector_store %arg11[%c16_147, %c56_148], %137 {strides = array<i32>} : memref<64x128xf32, #tpu.memory_space<vmem>>, vector<8x8xf32>,
    %c42 = arith.constant 42 : index
    %c0_149 = arith.constant 0 : index
    %139 = vector.load %arg10[%c42, %c0_149] : memref<104x8xf32, #tpu.memory_space<vmem>>, vector<8x8xf32>
    %c16_150 = arith.constant 16 : index
    %c64_151 = arith.constant 64 : index
    %140 = vector.load %arg11[%c16_150, %c64_151] : memref<64x128xf32, #tpu.memory_space<vmem>>, vector<8x8xf32>
    tpu.vector_store %arg11[%c16_150, %c64_151], %139 {strides = array<i32>} : memref<64x128xf32, #tpu.memory_space<vmem>>, vector<8x8xf32>,
    %c30_152 = arith.constant 30 : index
    %c0_153 = arith.constant 0 : index
    %141 = vector.load %arg10[%c30_152, %c0_153] : memref<104x8xf32, #tpu.memory_space<vmem>>, vector<8x8xf32>
    %c24_154 = arith.constant 24 : index
    %c0_155 = arith.constant 0 : index
    %142 = vector.load %arg11[%c24_154, %c0_155] : memref<64x128xf32, #tpu.memory_space<vmem>>, vector<8x8xf32>
    tpu.vector_store %arg11[%c24_154, %c0_155], %141 {strides = array<i32>} : memref<64x128xf32, #tpu.memory_space<vmem>>, vector<8x8xf32>,
    %c31_156 = arith.constant 31 : index
    %c0_157 = arith.constant 0 : index
    %143 = vector.load %arg10[%c31_156, %c0_157] : memref<104x8xf32, #tpu.memory_space<vmem>>, vector<8x8xf32>
    %c24_158 = arith.constant 24 : index
    %c8_159 = arith.constant 8 : index
    %144 = vector.load %arg11[%c24_158, %c8_159] : memref<64x128xf32, #tpu.memory_space<vmem>>, vector<8x8xf32>
    tpu.vector_store %arg11[%c24_158, %c8_159], %143 {strides = array<i32>} : memref<64x128xf32, #tpu.memory_space<vmem>>, vector<8x8xf32>,
    %c32_160 = arith.constant 32 : index
    %c0_161 = arith.constant 0 : index
    %145 = vector.load %arg10[%c32_160, %c0_161] : memref<104x8xf32, #tpu.memory_space<vmem>>, vector<8x8xf32>
    %c24_162 = arith.constant 24 : index
    %c16_163 = arith.constant 16 : index
    %146 = vector.load %arg11[%c24_162, %c16_163] : memref<64x128xf32, #tpu.memory_space<vmem>>, vector<8x8xf32>
    tpu.vector_store %arg11[%c24_162, %c16_163], %145 {strides = array<i32>} : memref<64x128xf32, #tpu.memory_space<vmem>>, vector<8x8xf32>,
    %c40_164 = arith.constant 40 : index
    %c0_165 = arith.constant 0 : index
    %147 = vector.load %arg10[%c40_164, %c0_165] : memref<104x8xf32, #tpu.memory_space<vmem>>, vector<8x8xf32>
    %c24_166 = arith.constant 24 : index
    %c24_167 = arith.constant 24 : index
    %148 = vector.load %arg11[%c24_166, %c24_167] : memref<64x128xf32, #tpu.memory_space<vmem>>, vector<8x8xf32>
    tpu.vector_store %arg11[%c24_166, %c24_167], %147 {strides = array<i32>} : memref<64x128xf32, #tpu.memory_space<vmem>>, vector<8x8xf32>,
    %c41_168 = arith.constant 41 : index
    %c0_169 = arith.constant 0 : index
    %149 = vector.load %arg10[%c41_168, %c0_169] : memref<104x8xf32, #tpu.memory_space<vmem>>, vector<8x8xf32>
    %c24_170 = arith.constant 24 : index
    %c32_171 = arith.constant 32 : index
    %150 = vector.load %arg11[%c24_170, %c32_171] : memref<64x128xf32, #tpu.memory_space<vmem>>, vector<8x8xf32>
    tpu.vector_store %arg11[%c24_170, %c32_171], %149 {strides = array<i32>} : memref<64x128xf32, #tpu.memory_space<vmem>>, vector<8x8xf32>,
    %c42_172 = arith.constant 42 : index
    %c0_173 = arith.constant 0 : index
    %151 = vector.load %arg10[%c42_172, %c0_173] : memref<104x8xf32, #tpu.memory_space<vmem>>, vector<8x8xf32>
    %c24_174 = arith.constant 24 : index
    %c40_175 = arith.constant 40 : index
    %152 = vector.load %arg11[%c24_174, %c40_175] : memref<64x128xf32, #tpu.memory_space<vmem>>, vector<8x8xf32>
    tpu.vector_store %arg11[%c24_174, %c40_175], %151 {strides = array<i32>} : memref<64x128xf32, #tpu.memory_space<vmem>>, vector<8x8xf32>,
    %c50 = arith.constant 50 : index
    %c0_176 = arith.constant 0 : index
    %153 = vector.load %arg10[%c50, %c0_176] : memref<104x8xf32, #tpu.memory_space<vmem>>, vector<8x8xf32>
    %c24_177 = arith.constant 24 : index
    %c48_178 = arith.constant 48 : index
    %154 = vector.load %arg11[%c24_177, %c48_178] : memref<64x128xf32, #tpu.memory_space<vmem>>, vector<8x8xf32>
    tpu.vector_store %arg11[%c24_177, %c48_178], %153 {strides = array<i32>} : memref<64x128xf32, #tpu.memory_space<vmem>>, vector<8x8xf32>,
    %c51_179 = arith.constant 51 : index
    %c0_180 = arith.constant 0 : index
    %155 = vector.load %arg10[%c51_179, %c0_180] : memref<104x8xf32, #tpu.memory_space<vmem>>, vector<8x8xf32>
    %c24_181 = arith.constant 24 : index
    %c56_182 = arith.constant 56 : index
    %156 = vector.load %arg11[%c24_181, %c56_182] : memref<64x128xf32, #tpu.memory_space<vmem>>, vector<8x8xf32>
    tpu.vector_store %arg11[%c24_181, %c56_182], %155 {strides = array<i32>} : memref<64x128xf32, #tpu.memory_space<vmem>>, vector<8x8xf32>,
    %c52 = arith.constant 52 : index
    %c0_183 = arith.constant 0 : index
    %157 = vector.load %arg10[%c52, %c0_183] : memref<104x8xf32, #tpu.memory_space<vmem>>, vector<8x8xf32>
    %c24_184 = arith.constant 24 : index
    %c64_185 = arith.constant 64 : index
    %158 = vector.load %arg11[%c24_184, %c64_185] : memref<64x128xf32, #tpu.memory_space<vmem>>, vector<8x8xf32>
    tpu.vector_store %arg11[%c24_184, %c64_185], %157 {strides = array<i32>} : memref<64x128xf32, #tpu.memory_space<vmem>>, vector<8x8xf32>,
    %c40_186 = arith.constant 40 : index
    %c0_187 = arith.constant 0 : index
    %159 = vector.load %arg10[%c40_186, %c0_187] : memref<104x8xf32, #tpu.memory_space<vmem>>, vector<8x8xf32>
    %c32_188 = arith.constant 32 : index
    %c0_189 = arith.constant 0 : index
    %160 = vector.load %arg11[%c32_188, %c0_189] : memref<64x128xf32, #tpu.memory_space<vmem>>, vector<8x8xf32>
    tpu.vector_store %arg11[%c32_188, %c0_189], %159 {strides = array<i32>} : memref<64x128xf32, #tpu.memory_space<vmem>>, vector<8x8xf32>,
    %c41_190 = arith.constant 41 : index
    %c0_191 = arith.constant 0 : index
    %161 = vector.load %arg10[%c41_190, %c0_191] : memref<104x8xf32, #tpu.memory_space<vmem>>, vector<8x8xf32>
    %c32_192 = arith.constant 32 : index
    %c8_193 = arith.constant 8 : index
    %162 = vector.load %arg11[%c32_192, %c8_193] : memref<64x128xf32, #tpu.memory_space<vmem>>, vector<8x8xf32>
    tpu.vector_store %arg11[%c32_192, %c8_193], %161 {strides = array<i32>} : memref<64x128xf32, #tpu.memory_space<vmem>>, vector<8x8xf32>,
    %c42_194 = arith.constant 42 : index
    %c0_195 = arith.constant 0 : index
    %163 = vector.load %arg10[%c42_194, %c0_195] : memref<104x8xf32, #tpu.memory_space<vmem>>, vector<8x8xf32>
    %c32_196 = arith.constant 32 : index
    %c16_197 = arith.constant 16 : index
    %164 = vector.load %arg11[%c32_196, %c16_197] : memref<64x128xf32, #tpu.memory_space<vmem>>, vector<8x8xf32>
    tpu.vector_store %arg11[%c32_196, %c16_197], %163 {strides = array<i32>} : memref<64x128xf32, #tpu.memory_space<vmem>>, vector<8x8xf32>,
    %c50_198 = arith.constant 50 : index
    %c0_199 = arith.constant 0 : index
    %165 = vector.load %arg10[%c50_198, %c0_199] : memref<104x8xf32, #tpu.memory_space<vmem>>, vector<8x8xf32>
    %c32_200 = arith.constant 32 : index
    %c24_201 = arith.constant 24 : index
    %166 = vector.load %arg11[%c32_200, %c24_201] : memref<64x128xf32, #tpu.memory_space<vmem>>, vector<8x8xf32>
    tpu.vector_store %arg11[%c32_200, %c24_201], %165 {strides = array<i32>} : memref<64x128xf32, #tpu.memory_space<vmem>>, vector<8x8xf32>,
    %c51_202 = arith.constant 51 : index
    %c0_203 = arith.constant 0 : index
    %167 = vector.load %arg10[%c51_202, %c0_203] : memref<104x8xf32, #tpu.memory_space<vmem>>, vector<8x8xf32>
    %c32_204 = arith.constant 32 : index
    %c32_205 = arith.constant 32 : index
    %168 = vector.load %arg11[%c32_204, %c32_205] : memref<64x128xf32, #tpu.memory_space<vmem>>, vector<8x8xf32>
    tpu.vector_store %arg11[%c32_204, %c32_205], %167 {strides = array<i32>} : memref<64x128xf32, #tpu.memory_space<vmem>>, vector<8x8xf32>,
    %c52_206 = arith.constant 52 : index
    %c0_207 = arith.constant 0 : index
    %169 = vector.load %arg10[%c52_206, %c0_207] : memref<104x8xf32, #tpu.memory_space<vmem>>, vector<8x8xf32>
    %c32_208 = arith.constant 32 : index
    %c40_209 = arith.constant 40 : index
    %170 = vector.load %arg11[%c32_208, %c40_209] : memref<64x128xf32, #tpu.memory_space<vmem>>, vector<8x8xf32>
    tpu.vector_store %arg11[%c32_208, %c40_209], %169 {strides = array<i32>} : memref<64x128xf32, #tpu.memory_space<vmem>>, vector<8x8xf32>,
    %c60 = arith.constant 60 : index
    %c0_210 = arith.constant 0 : index
    %171 = vector.load %arg10[%c60, %c0_210] : memref<104x8xf32, #tpu.memory_space<vmem>>, vector<8x8xf32>
    %c32_211 = arith.constant 32 : index
    %c48_212 = arith.constant 48 : index
    %172 = vector.load %arg11[%c32_211, %c48_212] : memref<64x128xf32, #tpu.memory_space<vmem>>, vector<8x8xf32>
    tpu.vector_store %arg11[%c32_211, %c48_212], %171 {strides = array<i32>} : memref<64x128xf32, #tpu.memory_space<vmem>>, vector<8x8xf32>,
    %c61_213 = arith.constant 61 : index
    %c0_214 = arith.constant 0 : index
    %173 = vector.load %arg10[%c61_213, %c0_214] : memref<104x8xf32, #tpu.memory_space<vmem>>, vector<8x8xf32>
    %c32_215 = arith.constant 32 : index
    %c56_216 = arith.constant 56 : index
    %174 = vector.load %arg11[%c32_215, %c56_216] : memref<64x128xf32, #tpu.memory_space<vmem>>, vector<8x8xf32>
    tpu.vector_store %arg11[%c32_215, %c56_216], %173 {strides = array<i32>} : memref<64x128xf32, #tpu.memory_space<vmem>>, vector<8x8xf32>,
    %c62 = arith.constant 62 : index
    %c0_217 = arith.constant 0 : index
    %175 = vector.load %arg10[%c62, %c0_217] : memref<104x8xf32, #tpu.memory_space<vmem>>, vector<8x8xf32>
    %c32_218 = arith.constant 32 : index
    %c64_219 = arith.constant 64 : index
    %176 = vector.load %arg11[%c32_218, %c64_219] : memref<64x128xf32, #tpu.memory_space<vmem>>, vector<8x8xf32>
    tpu.vector_store %arg11[%c32_218, %c64_219], %175 {strides = array<i32>} : memref<64x128xf32, #tpu.memory_space<vmem>>, vector<8x8xf32>,
    %c50_220 = arith.constant 50 : index
    %c0_221 = arith.constant 0 : index
    %177 = vector.load %arg10[%c50_220, %c0_221] : memref<104x8xf32, #tpu.memory_space<vmem>>, vector<8x8xf32>
    %c40_222 = arith.constant 40 : index
    %c0_223 = arith.constant 0 : index
    %178 = vector.load %arg11[%c40_222, %c0_223] : memref<64x128xf32, #tpu.memory_space<vmem>>, vector<8x8xf32>
    tpu.vector_store %arg11[%c40_222, %c0_223], %177 {strides = array<i32>} : memref<64x128xf32, #tpu.memory_space<vmem>>, vector<8x8xf32>,
    %c51_224 = arith.constant 51 : index
    %c0_225 = arith.constant 0 : index
    %179 = vector.load %arg10[%c51_224, %c0_225] : memref<104x8xf32, #tpu.memory_space<vmem>>, vector<8x8xf32>
    %c40_226 = arith.constant 40 : index
    %c8_227 = arith.constant 8 : index
    %180 = vector.load %arg11[%c40_226, %c8_227] : memref<64x128xf32, #tpu.memory_space<vmem>>, vector<8x8xf32>
    tpu.vector_store %arg11[%c40_226, %c8_227], %179 {strides = array<i32>} : memref<64x128xf32, #tpu.memory_space<vmem>>, vector<8x8xf32>,
    %c52_228 = arith.constant 52 : index
    %c0_229 = arith.constant 0 : index
    %181 = vector.load %arg10[%c52_228, %c0_229] : memref<104x8xf32, #tpu.memory_space<vmem>>, vector<8x8xf32>
    %c40_230 = arith.constant 40 : index
    %c16_231 = arith.constant 16 : index
    %182 = vector.load %arg11[%c40_230, %c16_231] : memref<64x128xf32, #tpu.memory_space<vmem>>, vector<8x8xf32>
    tpu.vector_store %arg11[%c40_230, %c16_231], %181 {strides = array<i32>} : memref<64x128xf32, #tpu.memory_space<vmem>>, vector<8x8xf32>,
    %c60_232 = arith.constant 60 : index
    %c0_233 = arith.constant 0 : index
    %183 = vector.load %arg10[%c60_232, %c0_233] : memref<104x8xf32, #tpu.memory_space<vmem>>, vector<8x8xf32>
    %c40_234 = arith.constant 40 : index
    %c24_235 = arith.constant 24 : index
    %184 = vector.load %arg11[%c40_234, %c24_235] : memref<64x128xf32, #tpu.memory_space<vmem>>, vector<8x8xf32>
    tpu.vector_store %arg11[%c40_234, %c24_235], %183 {strides = array<i32>} : memref<64x128xf32, #tpu.memory_space<vmem>>, vector<8x8xf32>,
    %c61_236 = arith.constant 61 : index
    %c0_237 = arith.constant 0 : index
    %185 = vector.load %arg10[%c61_236, %c0_237] : memref<104x8xf32, #tpu.memory_space<vmem>>, vector<8x8xf32>
    %c40_238 = arith.constant 40 : index
    %c32_239 = arith.constant 32 : index
    %186 = vector.load %arg11[%c40_238, %c32_239] : memref<64x128xf32, #tpu.memory_space<vmem>>, vector<8x8xf32>
    tpu.vector_store %arg11[%c40_238, %c32_239], %185 {strides = array<i32>} : memref<64x128xf32, #tpu.memory_space<vmem>>, vector<8x8xf32>,
    %c62_240 = arith.constant 62 : index
    %c0_241 = arith.constant 0 : index
    %187 = vector.load %arg10[%c62_240, %c0_241] : memref<104x8xf32, #tpu.memory_space<vmem>>, vector<8x8xf32>
    %c40_242 = arith.constant 40 : index
    %c40_243 = arith.constant 40 : index
    %188 = vector.load %arg11[%c40_242, %c40_243] : memref<64x128xf32, #tpu.memory_space<vmem>>, vector<8x8xf32>
    tpu.vector_store %arg11[%c40_242, %c40_243], %187 {strides = array<i32>} : memref<64x128xf32, #tpu.memory_space<vmem>>, vector<8x8xf32>,
    %c70 = arith.constant 70 : index
    %c0_244 = arith.constant 0 : index
    %189 = vector.load %arg10[%c70, %c0_244] : memref<104x8xf32, #tpu.memory_space<vmem>>, vector<8x8xf32>
    %c40_245 = arith.constant 40 : index
    %c48_246 = arith.constant 48 : index
    %190 = vector.load %arg11[%c40_245, %c48_246] : memref<64x128xf32, #tpu.memory_space<vmem>>, vector<8x8xf32>
    tpu.vector_store %arg11[%c40_245, %c48_246], %189 {strides = array<i32>} : memref<64x128xf32, #tpu.memory_space<vmem>>, vector<8x8xf32>,
    %c71_247 = arith.constant 71 : index
    %c0_248 = arith.constant 0 : index
    %191 = vector.load %arg10[%c71_247, %c0_248] : memref<104x8xf32, #tpu.memory_space<vmem>>, vector<8x8xf32>
    %c40_249 = arith.constant 40 : index
    %c56_250 = arith.constant 56 : index
    %192 = vector.load %arg11[%c40_249, %c56_250] : memref<64x128xf32, #tpu.memory_space<vmem>>, vector<8x8xf32>
    tpu.vector_store %arg11[%c40_249, %c56_250], %191 {strides = array<i32>} : memref<64x128xf32, #tpu.memory_space<vmem>>, vector<8x8xf32>,
    %c72 = arith.constant 72 : index
    %c0_251 = arith.constant 0 : index
    %193 = vector.load %arg10[%c72, %c0_251] : memref<104x8xf32, #tpu.memory_space<vmem>>, vector<8x8xf32>
    %c40_252 = arith.constant 40 : index
    %c64_253 = arith.constant 64 : index
    %194 = vector.load %arg11[%c40_252, %c64_253] : memref<64x128xf32, #tpu.memory_space<vmem>>, vector<8x8xf32>
    tpu.vector_store %arg11[%c40_252, %c64_253], %193 {strides = array<i32>} : memref<64x128xf32, #tpu.memory_space<vmem>>, vector<8x8xf32>,
    %c60_254 = arith.constant 60 : index
    %c0_255 = arith.constant 0 : index
    %195 = vector.load %arg10[%c60_254, %c0_255] : memref<104x8xf32, #tpu.memory_space<vmem>>, vector<8x8xf32>
    %c48_256 = arith.constant 48 : index
    %c0_257 = arith.constant 0 : index
    %196 = vector.load %arg11[%c48_256, %c0_257] : memref<64x128xf32, #tpu.memory_space<vmem>>, vector<8x8xf32>
    tpu.vector_store %arg11[%c48_256, %c0_257], %195 {strides = array<i32>} : memref<64x128xf32, #tpu.memory_space<vmem>>, vector<8x8xf32>,
    %c61_258 = arith.constant 61 : index
    %c0_259 = arith.constant 0 : index
    %197 = vector.load %arg10[%c61_258, %c0_259] : memref<104x8xf32, #tpu.memory_space<vmem>>, vector<8x8xf32>
    %c48_260 = arith.constant 48 : index
    %c8_261 = arith.constant 8 : index
    %198 = vector.load %arg11[%c48_260, %c8_261] : memref<64x128xf32, #tpu.memory_space<vmem>>, vector<8x8xf32>
    tpu.vector_store %arg11[%c48_260, %c8_261], %197 {strides = array<i32>} : memref<64x128xf32, #tpu.memory_space<vmem>>, vector<8x8xf32>,
    %c62_262 = arith.constant 62 : index
    %c0_263 = arith.constant 0 : index
    %199 = vector.load %arg10[%c62_262, %c0_263] : memref<104x8xf32, #tpu.memory_space<vmem>>, vector<8x8xf32>
    %c48_264 = arith.constant 48 : index
    %c16_265 = arith.constant 16 : index
    %200 = vector.load %arg11[%c48_264, %c16_265] : memref<64x128xf32, #tpu.memory_space<vmem>>, vector<8x8xf32>
    tpu.vector_store %arg11[%c48_264, %c16_265], %199 {strides = array<i32>} : memref<64x128xf32, #tpu.memory_space<vmem>>, vector<8x8xf32>,
    %c70_266 = arith.constant 70 : index
    %c0_267 = arith.constant 0 : index
    %201 = vector.load %arg10[%c70_266, %c0_267] : memref<104x8xf32, #tpu.memory_space<vmem>>, vector<8x8xf32>
    %c48_268 = arith.constant 48 : index
    %c24_269 = arith.constant 24 : index
    %202 = vector.load %arg11[%c48_268, %c24_269] : memref<64x128xf32, #tpu.memory_space<vmem>>, vector<8x8xf32>
    tpu.vector_store %arg11[%c48_268, %c24_269], %201 {strides = array<i32>} : memref<64x128xf32, #tpu.memory_space<vmem>>, vector<8x8xf32>,
    %c71_270 = arith.constant 71 : index
    %c0_271 = arith.constant 0 : index
    %203 = vector.load %arg10[%c71_270, %c0_271] : memref<104x8xf32, #tpu.memory_space<vmem>>, vector<8x8xf32>
    %c48_272 = arith.constant 48 : index
    %c32_273 = arith.constant 32 : index
    %204 = vector.load %arg11[%c48_272, %c32_273] : memref<64x128xf32, #tpu.memory_space<vmem>>, vector<8x8xf32>
    tpu.vector_store %arg11[%c48_272, %c32_273], %203 {strides = array<i32>} : memref<64x128xf32, #tpu.memory_space<vmem>>, vector<8x8xf32>,
    %c72_274 = arith.constant 72 : index
    %c0_275 = arith.constant 0 : index
    %205 = vector.load %arg10[%c72_274, %c0_275] : memref<104x8xf32, #tpu.memory_space<vmem>>, vector<8x8xf32>
    %c48_276 = arith.constant 48 : index
    %c40_277 = arith.constant 40 : index
    %206 = vector.load %arg11[%c48_276, %c40_277] : memref<64x128xf32, #tpu.memory_space<vmem>>, vector<8x8xf32>
    tpu.vector_store %arg11[%c48_276, %c40_277], %205 {strides = array<i32>} : memref<64x128xf32, #tpu.memory_space<vmem>>, vector<8x8xf32>,
    %c80_278 = arith.constant 80 : index
    %c0_279 = arith.constant 0 : index
    %207 = vector.load %arg10[%c80_278, %c0_279] : memref<104x8xf32, #tpu.memory_space<vmem>>, vector<8x8xf32>
    %c48_280 = arith.constant 48 : index
    %c48_281 = arith.constant 48 : index
    %208 = vector.load %arg11[%c48_280, %c48_281] : memref<64x128xf32, #tpu.memory_space<vmem>>, vector<8x8xf32>
    tpu.vector_store %arg11[%c48_280, %c48_281], %207 {strides = array<i32>} : memref<64x128xf32, #tpu.memory_space<vmem>>, vector<8x8xf32>,
    %c81_282 = arith.constant 81 : index
    %c0_283 = arith.constant 0 : index
    %209 = vector.load %arg10[%c81_282, %c0_283] : memref<104x8xf32, #tpu.memory_space<vmem>>, vector<8x8xf32>
    %c48_284 = arith.constant 48 : index
    %c56_285 = arith.constant 56 : index
    %210 = vector.load %arg11[%c48_284, %c56_285] : memref<64x128xf32, #tpu.memory_space<vmem>>, vector<8x8xf32>
    tpu.vector_store %arg11[%c48_284, %c56_285], %209 {strides = array<i32>} : memref<64x128xf32, #tpu.memory_space<vmem>>, vector<8x8xf32>,
    %c82 = arith.constant 82 : index
    %c0_286 = arith.constant 0 : index
    %211 = vector.load %arg10[%c82, %c0_286] : memref<104x8xf32, #tpu.memory_space<vmem>>, vector<8x8xf32>
    %c48_287 = arith.constant 48 : index
    %c64_288 = arith.constant 64 : index
    %212 = vector.load %arg11[%c48_287, %c64_288] : memref<64x128xf32, #tpu.memory_space<vmem>>, vector<8x8xf32>
    tpu.vector_store %arg11[%c48_287, %c64_288], %211 {strides = array<i32>} : memref<64x128xf32, #tpu.memory_space<vmem>>, vector<8x8xf32>,
    %c70_289 = arith.constant 70 : index
    %c0_290 = arith.constant 0 : index
    %213 = vector.load %arg10[%c70_289, %c0_290] : memref<104x8xf32, #tpu.memory_space<vmem>>, vector<8x8xf32>
    %c56_291 = arith.constant 56 : index
    %c0_292 = arith.constant 0 : index
    %214 = vector.load %arg11[%c56_291, %c0_292] : memref<64x128xf32, #tpu.memory_space<vmem>>, vector<8x8xf32>
    tpu.vector_store %arg11[%c56_291, %c0_292], %213 {strides = array<i32>} : memref<64x128xf32, #tpu.memory_space<vmem>>, vector<8x8xf32>,
    %c71_293 = arith.constant 71 : index
    %c0_294 = arith.constant 0 : index
    %215 = vector.load %arg10[%c71_293, %c0_294] : memref<104x8xf32, #tpu.memory_space<vmem>>, vector<8x8xf32>
    %c56_295 = arith.constant 56 : index
    %c8_296 = arith.constant 8 : index
    %216 = vector.load %arg11[%c56_295, %c8_296] : memref<64x128xf32, #tpu.memory_space<vmem>>, vector<8x8xf32>
    tpu.vector_store %arg11[%c56_295, %c8_296], %215 {strides = array<i32>} : memref<64x128xf32, #tpu.memory_space<vmem>>, vector<8x8xf32>,
    %c72_297 = arith.constant 72 : index
    %c0_298 = arith.constant 0 : index
    %217 = vector.load %arg10[%c72_297, %c0_298] : memref<104x8xf32, #tpu.memory_space<vmem>>, vector<8x8xf32>
    %c56_299 = arith.constant 56 : index
    %c16_300 = arith.constant 16 : index
    %218 = vector.load %arg11[%c56_299, %c16_300] : memref<64x128xf32, #tpu.memory_space<vmem>>, vector<8x8xf32>
    tpu.vector_store %arg11[%c56_299, %c16_300], %217 {strides = array<i32>} : memref<64x128xf32, #tpu.memory_space<vmem>>, vector<8x8xf32>,
    %c80_301 = arith.constant 80 : index
    %c0_302 = arith.constant 0 : index
    %219 = vector.load %arg10[%c80_301, %c0_302] : memref<104x8xf32, #tpu.memory_space<vmem>>, vector<8x8xf32>
    %c56_303 = arith.constant 56 : index
    %c24_304 = arith.constant 24 : index
    %220 = vector.load %arg11[%c56_303, %c24_304] : memref<64x128xf32, #tpu.memory_space<vmem>>, vector<8x8xf32>
    tpu.vector_store %arg11[%c56_303, %c24_304], %219 {strides = array<i32>} : memref<64x128xf32, #tpu.memory_space<vmem>>, vector<8x8xf32>,
    %c81_305 = arith.constant 81 : index
    %c0_306 = arith.constant 0 : index
    %221 = vector.load %arg10[%c81_305, %c0_306] : memref<104x8xf32, #tpu.memory_space<vmem>>, vector<8x8xf32>
    %c56_307 = arith.constant 56 : index
    %c32_308 = arith.constant 32 : index
    %222 = vector.load %arg11[%c56_307, %c32_308] : memref<64x128xf32, #tpu.memory_space<vmem>>, vector<8x8xf32>
    tpu.vector_store %arg11[%c56_307, %c32_308], %221 {strides = array<i32>} : memref<64x128xf32, #tpu.memory_space<vmem>>, vector<8x8xf32>,
    %c82_309 = arith.constant 82 : index
    %c0_310 = arith.constant 0 : index
    %223 = vector.load %arg10[%c82_309, %c0_310] : memref<104x8xf32, #tpu.memory_space<vmem>>, vector<8x8xf32>
    %c56_311 = arith.constant 56 : index
    %c40_312 = arith.constant 40 : index
    %224 = vector.load %arg11[%c56_311, %c40_312] : memref<64x128xf32, #tpu.memory_space<vmem>>, vector<8x8xf32>
    tpu.vector_store %arg11[%c56_311, %c40_312], %223 {strides = array<i32>} : memref<64x128xf32, #tpu.memory_space<vmem>>, vector<8x8xf32>,
    %c90 = arith.constant 90 : index
    %c0_313 = arith.constant 0 : index
    %225 = vector.load %arg10[%c90, %c0_313] : memref<104x8xf32, #tpu.memory_space<vmem>>, vector<8x8xf32>
    %c56_314 = arith.constant 56 : index
    %c48_315 = arith.constant 48 : index
    %226 = vector.load %arg11[%c56_314, %c48_315] : memref<64x128xf32, #tpu.memory_space<vmem>>, vector<8x8xf32>
    tpu.vector_store %arg11[%c56_314, %c48_315], %225 {strides = array<i32>} : memref<64x128xf32, #tpu.memory_space<vmem>>, vector<8x8xf32>,
    %c91 = arith.constant 91 : index
    %c0_316 = arith.constant 0 : index
    %227 = vector.load %arg10[%c91, %c0_316] : memref<104x8xf32, #tpu.memory_space<vmem>>, vector<8x8xf32>
    %c56_317 = arith.constant 56 : index
    %c56_318 = arith.constant 56 : index
    %228 = vector.load %arg11[%c56_317, %c56_318] : memref<64x128xf32, #tpu.memory_space<vmem>>, vector<8x8xf32>
    tpu.vector_store %arg11[%c56_317, %c56_318], %227 {strides = array<i32>} : memref<64x128xf32, #tpu.memory_space<vmem>>, vector<8x8xf32>,
    %c92 = arith.constant 92 : index
    %c0_319 = arith.constant 0 : index
    %229 = vector.load %arg10[%c92, %c0_319] : memref<104x8xf32, #tpu.memory_space<vmem>>, vector<8x8xf32>
    %c56_320 = arith.constant 56 : index
    %c64_321 = arith.constant 64 : index
    %230 = vector.load %arg11[%c56_320, %c64_321] : memref<64x128xf32, #tpu.memory_space<vmem>>, vector<8x8xf32>
    tpu.vector_store %arg11[%c56_320, %c64_321], %229 {strides = array<i32>} : memref<64x128xf32, #tpu.memory_space<vmem>>, vector<8x8xf32>,
    %c0_322 = arith.constant 0 : index
    %c0_323 = arith.constant 0 : index
    %231 = vector.load %arg11[%c0_322, %c0_323] : memref<64x128xf32, #tpu.memory_space<vmem>>, vector<64x128xf32>
    %c0_324 = arith.constant 0 : index
    %c0_325 = arith.constant 0 : index
    %232 = vector.load %arg3[%c0_324, %c0_325] : memref<128x128xf32, #tpu.memory_space<vmem>>, vector<128x128xf32>
    %cst_326 = arith.constant dense<0.000000e+00> : vector<64x128xf32>
    %233 = tpu.matmul %231, %232, %cst_326 {dimension_numbers = #tpu.dot_dimension_numbers<[1], [0], [0], [1], [0, 0, 1, 1], [], []>} : vector<64x128xf32>, vector<128x128xf32>, vector<64x128xf32> -> vector<64x128xf32>
    %cst_327 = arith.constant 0.000000e+00 : f32
    %234 = vector.broadcast %cst_327 : f32 to vector<64x128xf32>
    %235 = arith.maximumf %233, %234 : vector<64x128xf32>
    %c0_328 = arith.constant 0 : index
    %c0_329 = arith.constant 0 : index
    %236 = vector.load %arg12[%c0_328, %c0_329] : memref<64x128xf32, #tpu.memory_space<vmem>>, vector<64x128xf32>
    tpu.vector_store %arg12[%c0_328, %c0_329], %235 {strides = array<i32>} : memref<64x128xf32, #tpu.memory_space<vmem>>, vector<64x128xf32>,
    %c0_330 = arith.constant 0 : index
    %c0_331 = arith.constant 0 : index
    %237 = tpu.strided_load %arg12[%c0_330, %c0_331] {strides = array<i32: 2, 1>} : memref<64x128xf32, #tpu.memory_space<vmem>>, vector<4x128xf32>
    %c1_332 = arith.constant 1 : index
    %c0_333 = arith.constant 0 : index
    %238 = tpu.strided_load %arg12[%c1_332, %c0_333] {strides = array<i32: 2, 1>} : memref<64x128xf32, #tpu.memory_space<vmem>>, vector<4x128xf32>
    %c8_334 = arith.constant 8 : index
    %c0_335 = arith.constant 0 : index
    %239 = tpu.strided_load %arg12[%c8_334, %c0_335] {strides = array<i32: 2, 1>} : memref<64x128xf32, #tpu.memory_space<vmem>>, vector<4x128xf32>
    %c9 = arith.constant 9 : index
    %c0_336 = arith.constant 0 : index
    %240 = tpu.strided_load %arg12[%c9, %c0_336] {strides = array<i32: 2, 1>} : memref<64x128xf32, #tpu.memory_space<vmem>>, vector<4x128xf32>
    %241 = arith.maximumf %237, %238 : vector<4x128xf32>
    %242 = arith.maximumf %239, %240 : vector<4x128xf32>
    %243 = arith.maximumf %241, %242 : vector<4x128xf32>
    %244 = vector.extract_strided_slice %243 {offsets = [0, 0], sizes = [1, 16], strides = [1, 1]} : vector<4x128xf32> to vector<1x16xf32>
    %c0_337 = arith.constant 0 : index
    %c0_338 = arith.constant 0 : index
    %245 = vector.load %arg13[%c0_337, %c0_338] : memref<1x256xf32, #tpu.memory_space<vmem>>, vector<1x16xf32>
    tpu.vector_store %arg13[%c0_337, %c0_338], %244 {strides = array<i32>} : memref<1x256xf32, #tpu.memory_space<vmem>>, vector<1x16xf32>,
    %246 = vector.extract_strided_slice %243 {offsets = [1, 0], sizes = [1, 16], strides = [1, 1]} : vector<4x128xf32> to vector<1x16xf32>
    %c0_339 = arith.constant 0 : index
    %c16_340 = arith.constant 16 : index
    %247 = vector.load %arg13[%c0_339, %c16_340] : memref<1x256xf32, #tpu.memory_space<vmem>>, vector<1x16xf32>
    tpu.vector_store %arg13[%c0_339, %c16_340], %246 {strides = array<i32>} : memref<1x256xf32, #tpu.memory_space<vmem>>, vector<1x16xf32>,
    %248 = vector.extract_strided_slice %243 {offsets = [2, 0], sizes = [1, 16], strides = [1, 1]} : vector<4x128xf32> to vector<1x16xf32>
    %c0_341 = arith.constant 0 : index
    %c32_342 = arith.constant 32 : index
    %249 = vector.load %arg13[%c0_341, %c32_342] : memref<1x256xf32, #tpu.memory_space<vmem>>, vector<1x16xf32>
    tpu.vector_store %arg13[%c0_341, %c32_342], %248 {strides = array<i32>} : memref<1x256xf32, #tpu.memory_space<vmem>>, vector<1x16xf32>,
    %250 = vector.extract_strided_slice %243 {offsets = [3, 0], sizes = [1, 16], strides = [1, 1]} : vector<4x128xf32> to vector<1x16xf32>
    %c0_343 = arith.constant 0 : index
    %c48_344 = arith.constant 48 : index
    %251 = vector.load %arg13[%c0_343, %c48_344] : memref<1x256xf32, #tpu.memory_space<vmem>>, vector<1x16xf32>
    tpu.vector_store %arg13[%c0_343, %c48_344], %250 {strides = array<i32>} : memref<1x256xf32, #tpu.memory_space<vmem>>, vector<1x16xf32>,
    %c16_345 = arith.constant 16 : index
    %c0_346 = arith.constant 0 : index
    %252 = tpu.strided_load %arg12[%c16_345, %c0_346] {strides = array<i32: 2, 1>} : memref<64x128xf32, #tpu.memory_space<vmem>>, vector<4x128xf32>
    %c17_347 = arith.constant 17 : index
    %c0_348 = arith.constant 0 : index
    %253 = tpu.strided_load %arg12[%c17_347, %c0_348] {strides = array<i32: 2, 1>} : memref<64x128xf32, #tpu.memory_space<vmem>>, vector<4x128xf32>
    %c24_349 = arith.constant 24 : index
    %c0_350 = arith.constant 0 : index
    %254 = tpu.strided_load %arg12[%c24_349, %c0_350] {strides = array<i32: 2, 1>} : memref<64x128xf32, #tpu.memory_space<vmem>>, vector<4x128xf32>
    %c25 = arith.constant 25 : index
    %c0_351 = arith.constant 0 : index
    %255 = tpu.strided_load %arg12[%c25, %c0_351] {strides = array<i32: 2, 1>} : memref<64x128xf32, #tpu.memory_space<vmem>>, vector<4x128xf32>
    %256 = arith.maximumf %252, %253 : vector<4x128xf32>
    %257 = arith.maximumf %254, %255 : vector<4x128xf32>
    %258 = arith.maximumf %256, %257 : vector<4x128xf32>
    %259 = vector.extract_strided_slice %258 {offsets = [0, 0], sizes = [1, 16], strides = [1, 1]} : vector<4x128xf32> to vector<1x16xf32>
    %c0_352 = arith.constant 0 : index
    %c64_353 = arith.constant 64 : index
    %260 = vector.load %arg13[%c0_352, %c64_353] : memref<1x256xf32, #tpu.memory_space<vmem>>, vector<1x16xf32>
    tpu.vector_store %arg13[%c0_352, %c64_353], %259 {strides = array<i32>} : memref<1x256xf32, #tpu.memory_space<vmem>>, vector<1x16xf32>,
    %261 = vector.extract_strided_slice %258 {offsets = [1, 0], sizes = [1, 16], strides = [1, 1]} : vector<4x128xf32> to vector<1x16xf32>
    %c0_354 = arith.constant 0 : index
    %c80_355 = arith.constant 80 : index
    %262 = vector.load %arg13[%c0_354, %c80_355] : memref<1x256xf32, #tpu.memory_space<vmem>>, vector<1x16xf32>
    tpu.vector_store %arg13[%c0_354, %c80_355], %261 {strides = array<i32>} : memref<1x256xf32, #tpu.memory_space<vmem>>, vector<1x16xf32>,
    %263 = vector.extract_strided_slice %258 {offsets = [2, 0], sizes = [1, 16], strides = [1, 1]} : vector<4x128xf32> to vector<1x16xf32>
    %c0_356 = arith.constant 0 : index
    %c96_357 = arith.constant 96 : index
    %264 = vector.load %arg13[%c0_356, %c96_357] : memref<1x256xf32, #tpu.memory_space<vmem>>, vector<1x16xf32>
    tpu.vector_store %arg13[%c0_356, %c96_357], %263 {strides = array<i32>} : memref<1x256xf32, #tpu.memory_space<vmem>>, vector<1x16xf32>,
    %265 = vector.extract_strided_slice %258 {offsets = [3, 0], sizes = [1, 16], strides = [1, 1]} : vector<4x128xf32> to vector<1x16xf32>
    %c0_358 = arith.constant 0 : index
    %c112_359 = arith.constant 112 : index
    %266 = vector.load %arg13[%c0_358, %c112_359] : memref<1x256xf32, #tpu.memory_space<vmem>>, vector<1x16xf32>
    tpu.vector_store %arg13[%c0_358, %c112_359], %265 {strides = array<i32>} : memref<1x256xf32, #tpu.memory_space<vmem>>, vector<1x16xf32>,
    %c32_360 = arith.constant 32 : index
    %c0_361 = arith.constant 0 : index
    %267 = tpu.strided_load %arg12[%c32_360, %c0_361] {strides = array<i32: 2, 1>} : memref<64x128xf32, #tpu.memory_space<vmem>>, vector<4x128xf32>
    %c33_362 = arith.constant 33 : index
    %c0_363 = arith.constant 0 : index
    %268 = tpu.strided_load %arg12[%c33_362, %c0_363] {strides = array<i32: 2, 1>} : memref<64x128xf32, #tpu.memory_space<vmem>>, vector<4x128xf32>
    %c40_364 = arith.constant 40 : index
    %c0_365 = arith.constant 0 : index
    %269 = tpu.strided_load %arg12[%c40_364, %c0_365] {strides = array<i32: 2, 1>} : memref<64x128xf32, #tpu.memory_space<vmem>>, vector<4x128xf32>
    %c41_366 = arith.constant 41 : index
    %c0_367 = arith.constant 0 : index
    %270 = tpu.strided_load %arg12[%c41_366, %c0_367] {strides = array<i32: 2, 1>} : memref<64x128xf32, #tpu.memory_space<vmem>>, vector<4x128xf32>
    %271 = arith.maximumf %267, %268 : vector<4x128xf32>
    %272 = arith.maximumf %269, %270 : vector<4x128xf32>
    %273 = arith.maximumf %271, %272 : vector<4x128xf32>
    %274 = vector.extract_strided_slice %273 {offsets = [0, 0], sizes = [1, 16], strides = [1, 1]} : vector<4x128xf32> to vector<1x16xf32>
    %c0_368 = arith.constant 0 : index
    %c128_369 = arith.constant 128 : index
    %275 = vector.load %arg13[%c0_368, %c128_369] : memref<1x256xf32, #tpu.memory_space<vmem>>, vector<1x16xf32>
    tpu.vector_store %arg13[%c0_368, %c128_369], %274 {strides = array<i32>} : memref<1x256xf32, #tpu.memory_space<vmem>>, vector<1x16xf32>,
    %276 = vector.extract_strided_slice %273 {offsets = [1, 0], sizes = [1, 16], strides = [1, 1]} : vector<4x128xf32> to vector<1x16xf32>
    %c0_370 = arith.constant 0 : index
    %c144_371 = arith.constant 144 : index
    %277 = vector.load %arg13[%c0_370, %c144_371] : memref<1x256xf32, #tpu.memory_space<vmem>>, vector<1x16xf32>
    tpu.vector_store %arg13[%c0_370, %c144_371], %276 {strides = array<i32>} : memref<1x256xf32, #tpu.memory_space<vmem>>, vector<1x16xf32>,
    %278 = vector.extract_strided_slice %273 {offsets = [2, 0], sizes = [1, 16], strides = [1, 1]} : vector<4x128xf32> to vector<1x16xf32>
    %c0_372 = arith.constant 0 : index
    %c160_373 = arith.constant 160 : index
    %279 = vector.load %arg13[%c0_372, %c160_373] : memref<1x256xf32, #tpu.memory_space<vmem>>, vector<1x16xf32>
    tpu.vector_store %arg13[%c0_372, %c160_373], %278 {strides = array<i32>} : memref<1x256xf32, #tpu.memory_space<vmem>>, vector<1x16xf32>,
    %280 = vector.extract_strided_slice %273 {offsets = [3, 0], sizes = [1, 16], strides = [1, 1]} : vector<4x128xf32> to vector<1x16xf32>
    %c0_374 = arith.constant 0 : index
    %c176_375 = arith.constant 176 : index
    %281 = vector.load %arg13[%c0_374, %c176_375] : memref<1x256xf32, #tpu.memory_space<vmem>>, vector<1x16xf32>
    tpu.vector_store %arg13[%c0_374, %c176_375], %280 {strides = array<i32>} : memref<1x256xf32, #tpu.memory_space<vmem>>, vector<1x16xf32>,
    %c48_376 = arith.constant 48 : index
    %c0_377 = arith.constant 0 : index
    %282 = tpu.strided_load %arg12[%c48_376, %c0_377] {strides = array<i32: 2, 1>} : memref<64x128xf32, #tpu.memory_space<vmem>>, vector<4x128xf32>
    %c49_378 = arith.constant 49 : index
    %c0_379 = arith.constant 0 : index
    %283 = tpu.strided_load %arg12[%c49_378, %c0_379] {strides = array<i32: 2, 1>} : memref<64x128xf32, #tpu.memory_space<vmem>>, vector<4x128xf32>
    %c56_380 = arith.constant 56 : index
    %c0_381 = arith.constant 0 : index
    %284 = tpu.strided_load %arg12[%c56_380, %c0_381] {strides = array<i32: 2, 1>} : memref<64x128xf32, #tpu.memory_space<vmem>>, vector<4x128xf32>
    %c57 = arith.constant 57 : index
    %c0_382 = arith.constant 0 : index
    %285 = tpu.strided_load %arg12[%c57, %c0_382] {strides = array<i32: 2, 1>} : memref<64x128xf32, #tpu.memory_space<vmem>>, vector<4x128xf32>
    %286 = arith.maximumf %282, %283 : vector<4x128xf32>
    %287 = arith.maximumf %284, %285 : vector<4x128xf32>
    %288 = arith.maximumf %286, %287 : vector<4x128xf32>
    %289 = vector.extract_strided_slice %288 {offsets = [0, 0], sizes = [1, 16], strides = [1, 1]} : vector<4x128xf32> to vector<1x16xf32>
    %c0_383 = arith.constant 0 : index
    %c192_384 = arith.constant 192 : index
    %290 = vector.load %arg13[%c0_383, %c192_384] : memref<1x256xf32, #tpu.memory_space<vmem>>, vector<1x16xf32>
    tpu.vector_store %arg13[%c0_383, %c192_384], %289 {strides = array<i32>} : memref<1x256xf32, #tpu.memory_space<vmem>>, vector<1x16xf32>,
    %291 = vector.extract_strided_slice %288 {offsets = [1, 0], sizes = [1, 16], strides = [1, 1]} : vector<4x128xf32> to vector<1x16xf32>
    %c0_385 = arith.constant 0 : index
    %c208_386 = arith.constant 208 : index
    %292 = vector.load %arg13[%c0_385, %c208_386] : memref<1x256xf32, #tpu.memory_space<vmem>>, vector<1x16xf32>
    tpu.vector_store %arg13[%c0_385, %c208_386], %291 {strides = array<i32>} : memref<1x256xf32, #tpu.memory_space<vmem>>, vector<1x16xf32>,
    %293 = vector.extract_strided_slice %288 {offsets = [2, 0], sizes = [1, 16], strides = [1, 1]} : vector<4x128xf32> to vector<1x16xf32>
    %c0_387 = arith.constant 0 : index
    %c224_388 = arith.constant 224 : index
    %294 = vector.load %arg13[%c0_387, %c224_388] : memref<1x256xf32, #tpu.memory_space<vmem>>, vector<1x16xf32>
    tpu.vector_store %arg13[%c0_387, %c224_388], %293 {strides = array<i32>} : memref<1x256xf32, #tpu.memory_space<vmem>>, vector<1x16xf32>,
    %295 = vector.extract_strided_slice %288 {offsets = [3, 0], sizes = [1, 16], strides = [1, 1]} : vector<4x128xf32> to vector<1x16xf32>
    %c0_389 = arith.constant 0 : index
    %c240_390 = arith.constant 240 : index
    %296 = vector.load %arg13[%c0_389, %c240_390] : memref<1x256xf32, #tpu.memory_space<vmem>>, vector<1x16xf32>
    tpu.vector_store %arg13[%c0_389, %c240_390], %295 {strides = array<i32>} : memref<1x256xf32, #tpu.memory_space<vmem>>, vector<1x16xf32>,
    %c0_391 = arith.constant 0 : index
    %c0_392 = arith.constant 0 : index
    %297 = vector.load %arg13[%c0_391, %c0_392] : memref<1x256xf32, #tpu.memory_space<vmem>>, vector<1x256xf32>
    %c0_393 = arith.constant 0 : index
    %c0_394 = arith.constant 0 : index
    %298 = vector.load %arg4[%c0_393, %c0_394] : memref<256x128xf32, #tpu.memory_space<vmem>>, vector<256x128xf32>
    %cst_395 = arith.constant dense<0.000000e+00> : vector<1x128xf32>
    %299 = tpu.matmul %297, %298, %cst_395 {dimension_numbers = #tpu.dot_dimension_numbers<[1], [0], [0], [1], [0, 0, 1, 1], [], []>} : vector<1x256xf32>, vector<256x128xf32>, vector<1x128xf32> -> vector<1x128xf32>
    %c0_396 = arith.constant 0 : index
    %c0_397 = arith.constant 0 : index
    %300 = vector.load %arg5[%c0_396, %c0_397] : memref<1x128xf32, #tpu.memory_space<vmem>>, vector<1x128xf32>
    %301 = arith.addf %299, %300 : vector<1x128xf32>
    %cst_398 = arith.constant 0.000000e+00 : f32
    %302 = vector.broadcast %cst_398 : f32 to vector<1x128xf32>
    %303 = arith.maximumf %301, %302 : vector<1x128xf32>
    %c0_399 = arith.constant 0 : index
    %c0_400 = arith.constant 0 : index
    %304 = vector.load %arg6[%c0_399, %c0_400] : memref<128x128xf32, #tpu.memory_space<vmem>>, vector<128x128xf32>
    %cst_401 = arith.constant dense<0.000000e+00> : vector<1x128xf32>
    %305 = tpu.matmul %303, %304, %cst_401 {dimension_numbers = #tpu.dot_dimension_numbers<[1], [0], [0], [1], [0, 0, 1, 1], [], []>} : vector<1x128xf32>, vector<128x128xf32>, vector<1x128xf32> -> vector<1x128xf32>
    %c0_402 = arith.constant 0 : index
    %c0_403 = arith.constant 0 : index
    %306 = vector.load %arg7[%c0_402, %c0_403] : memref<1x128xf32, #tpu.memory_space<vmem>>, vector<1x128xf32>
    %307 = arith.addf %305, %306 : vector<1x128xf32>
    %c0_404 = arith.constant 0 : index
    %c0_405 = arith.constant 0 : index
    %308 = vector.load %arg8[%c0_404, %c0_405] : memref<1x128xf32, #tpu.memory_space<vmem>>, vector<1x128xf32>
    tpu.vector_store %arg8[%c0_404, %c0_405], %307 {strides = array<i32>} : memref<1x128xf32, #tpu.memory_space<vmem>>, vector<1x128xf32>,
    return
  }
  func.func @transform_0(%arg0: i32) -> (i32, i32) {
    %c0_i32 = arith.constant 0 : i32
    %c0_i32_0 = arith.constant 0 : i32
    %c0_i32_1 = arith.constant 0 : i32
    return %c0_i32, %c0_i32_0 : i32, i32
  }
  func.func @transform_1(%arg0: i32) -> (i32, i32) {
    %c0_i32 = arith.constant 0 : i32
    %c0_i32_0 = arith.constant 0 : i32
    %c0_i32_1 = arith.constant 0 : i32
    return %c0_i32, %c0_i32_0 : i32, i32
  }
  func.func @transform_2(%arg0: i32) -> (i32, i32) {
    %c0_i32 = arith.constant 0 : i32
    %c0_i32_0 = arith.constant 0 : i32
    %c0_i32_1 = arith.constant 0 : i32
    return %c0_i32, %c0_i32_0 : i32, i32
  }
  func.func @transform_3(%arg0: i32) -> (i32, i32) {
    %c0_i32 = arith.constant 0 : i32
    %c0_i32_0 = arith.constant 0 : i32
    %c0_i32_1 = arith.constant 0 : i32
    return %c0_i32, %c0_i32_0 : i32, i32
  }
  func.func @transform_4(%arg0: i32) -> (i32, i32) {
    %c0_i32 = arith.constant 0 : i32
    %c0_i32_0 = arith.constant 0 : i32
    %c0_i32_1 = arith.constant 0 : i32
    return %c0_i32, %c0_i32_0 : i32, i32
  }
  func.func @transform_5(%arg0: i32) -> (i32, i32) {
    %c0_i32 = arith.constant 0 : i32
    %c0_i32_0 = arith.constant 0 : i32
    %c0_i32_1 = arith.constant 0 : i32
    return %c0_i32, %c0_i32_0 : i32, i32
  }
  func.func @transform_6(%arg0: i32) -> (i32, i32) {
    %c0_i32 = arith.constant 0 : i32
    %c0_i32_0 = arith.constant 0 : i32
    %c0_i32_1 = arith.constant 0 : i32
    return %c0_i32, %c0_i32_0 : i32, i32
  }
  func.func @transform_7(%arg0: i32) -> (i32, i32) {
    %c0_i32 = arith.constant 0 : i32
    %c0_i32_0 = arith.constant 0 : i32
    %c0_i32_1 = arith.constant 0 : i32
    return %c0_i32, %c0_i32_0 : i32, i32
  }
}

</mosaic_0001>

<bundles_post_ra>
// kernel: model_forward.1
= control target key start
LH: loop header
LB: loop body
LE: loop exit
PB: predicated region body
PF: predicated region fallthrough
CT: control target
= control target key end

     0   :  { %vm61_vm0 = vcmask 130048   ;;  %s2771_s0 = inlined_call_operand.vmem [shape: f32[256,16], index: 0, kind: input, shape index: {}]   ;;  %s2772_s1 = inlined_call_operand.vmem [shape: f32[16,128], index: 1, kind: input, shape index: {}]   ;;  %s2773_s2 = inlined_call_operand.vmem [shape: f32[128,128], index: 2, kind: input, shape index: {}]   ;;  %s2774_s3 = inlined_call_operand.vmem [shape: f32[256,128], index: 3, kind: input, shape index: {}]   ;;  %s2775_s4 = inlined_call_operand.vmem [shape: f32[1,128], index: 4, kind: input, shape index: {}]   ;;  %s2776_s5 = inlined_call_operand.vmem [shape: f32[128,128], index: 5, kind: input, shape index: {}]   ;;  %s2777_s6 = inlined_call_operand.vmem [shape: f32[1,128], index: 6, kind: input, shape index: {}]   ;;  %s2778_s7 = inlined_call_operand.hbm [shape: f32[1,128], index: 7, kind: output, shape index: {}]  }
   0x1   :  { %v59_v0 = vld [vmem:[%s2772_s1] sm:$0xff]  ;;  %v60_v1 = vld [vmem:[%s2772_s1 + $0x8] sm:$0xff]  ;;  %v29_v5 = vld [vmem:[%s2771_s0 + $0x10] sm:$0xff] }
   0x2   :  { %v27_v2 = vld [vmem:[%s2771_s0] sm:$0xff]  ;;  %v1838_v3 = vpack.c.bf16 %v60_v1, %v59_v0  ;;  %v28_v4 = vld [vmem:[%s2771_s0 + $0x8] sm:$0xff]  ;;  %v30_v6 = vld [vmem:[%s2771_s0 + $0x18] sm:$0xff] }
   0x3   :  { %1711 = vmatprep.mubr.msk.f32.mxu0 %vm61_vm0, %v27_v2  ;;  %v31_v7 = vld [vmem:[%s2771_s0 + $0x20] sm:$0xff] }
   0x4   :  { %1839 = vmatprep.subr.bf16.mxu0 %v1838_v3 }
   0x5   :  { %1841 = vmatpush3.bf16.msra.mxu0 %v1838_v3 }
   0x8   :  { %1712 = vmatmul.mubr.msk.f32.vlgmr.msra.gmra.mrb[0].mxu0 %vm61_vm0, %v28_v4 }
   0x9   :  { %1714 = vmatprep.mubr.msk.f32.mxu0 %vm61_vm0, %v29_v5 }
   0xc   :  { %1715 = vmatmul.mubr.msk.f32.gmra.mrb[2].mxu0 %vm61_vm0, %v30_v6 }
   0xd   :  { %12 = vsyncpa [#allocation8], 0  ;;  %1717 = vmatprep.mubr.msk.f32.mxu0 %vm61_vm0, %v31_v7  ;;  %v32_v8 = vld [vmem:[%s2771_s0 + $0x28] sm:$0xff]  ;;  %v33_v9 = vld [vmem:[%s2771_s0 + $0x30] sm:$0xff]  ;;  %vm447_vm1 = vcmask 64512   ;;  %v1970_v35 = vmov 0.0   ;;  %v556_v38 = vlaneseq }
   0xe   :  { %v34_v10 = vld [vmem:[%s2771_s0 + $0x38] sm:$0xff]  ;;  %v35_v11 = vld [vmem:[%s2771_s0 + $0x40] sm:$0xff]  ;;  %v36_v12 = vld [vmem:[%s2771_s0 + $0x48] sm:$0xff]  ;;  %448 = vst.msk [vmem:[#allocation3] sm:$0xff] %vm447_vm1, %v1970_v35  ;;  %s1972_s20 = smov 16   ;;  %s1973_s21 = smov 48  }
   0xf   :  { %v37_v13 = vld [vmem:[%s2771_s0 + $0x50] sm:$0xff]  ;;  %v38_v14 = vld [vmem:[%s2771_s0 + $0x58] sm:$0xff]  ;;  %v39_v15 = vld [vmem:[%s2771_s0 + $0x60] sm:$0xff]  ;;  %449 = vst.msk [vmem:[#allocation3 + $0x8] sm:$0xff] %vm447_vm1, %v1970_v35  ;;  %v557_v40 = vand.u32 127, %v556_v38  ;;  %vm575_vm3 = vcmask 130112  }
  0x10   :  { %1718 = vmatmul.mubr.msk.f32.gmra.mrb[4].mxu0 %vm61_vm0, %v32_v8  ;;  %v40_v16 = vld [vmem:[%s2771_s0 + $0x68] sm:$0xff]  ;;  %v41_v17 = vld [vmem:[%s2771_s0 + $0x70] sm:$0xff]  ;;  %v42_v18 = vld [vmem:[%s2771_s0 + $0x78] sm:$0xff]  ;;  %450 = vst.msk [vmem:[#allocation3 + $0x10] sm:$0xff] %vm447_vm1, %v1970_v35  ;;  %vm582_vm4 = vcmask 195712   ;;  %s1974_s26 = smov 24  }
  0x11   :  { %1720 = vmatprep.mubr.msk.f32.mxu0 %vm61_vm0, %v33_v9  ;;  %v43_v19 = vld [vmem:[%s2771_s0 + $0x80] sm:$0xff]  ;;  %v44_v20 = vld [vmem:[%s2771_s0 + $0x88] sm:$0xff]  ;;  %v45_v21 = vld [vmem:[%s2771_s0 + $0x90] sm:$0xff]  ;;  %451 = vst.msk [vmem:[#allocation3 + $0x18] sm:$0xff] %vm447_vm1, %v1970_v35  ;;  %vm558_vm2 = vcmp.eq.s32.totalorder %v557_v40, 72  ;;  %s1975_s8 = smov 32  }
  0x12   :  { %v46_v22 = vld [vmem:[%s2771_s0 + $0x98] sm:$0xff]  ;;  %v47_v23 = vld [vmem:[%s2771_s0 + $0xa0] sm:$0xff]  ;;  %v48_v24 = vld [vmem:[%s2771_s0 + $0xa8] sm:$0xff]  ;;  %452 = vst.msk [vmem:[#allocation3 + $0x20] sm:$0xff] %vm447_vm1, %v1970_v35  ;;  %v559_v41 = vsel %vm558_vm2, 1.0, %v1970_v35  ;;  %s1976_s12 = smov 40  }
  0x13   :  { %v49_v25 = vld [vmem:[%s2771_s0 + $0xb0] sm:$0xff]  ;;  %v50_v26 = vld [vmem:[%s2771_s0 + $0xb8] sm:$0xff]  ;;  %v51_v27 = vld [vmem:[%s2771_s0 + $0xc0] sm:$0xff]  ;;  %453 = vst.msk [vmem:[#allocation3 + $0x28] sm:$0xff] %vm447_vm1, %v1970_v35  ;;  %s1977_s28 = smov 56   ;;  %s1978_s1 = smov 64  }
  0x14   :  { %1721 = vmatmul.mubr.msk.f32.gmra.mrb[6].mxu0 %vm61_vm0, %v34_v10  ;;  %v52_v28 = vld [vmem:[%s2771_s0 + $0xc8] sm:$0xff]  ;;  %v53_v29 = vld [vmem:[%s2771_s0 + $0xd0] sm:$0xff]  ;;  %v54_v30 = vld [vmem:[%s2771_s0 + $0xd8] sm:$0xff]  ;;  %454 = vst.msk [vmem:[#allocation3 + $0x30] sm:$0xff] %vm447_vm1, %v1970_v35  ;;  %vm589_vm5 = vcmask 261312   ;;  %vm596_vm6 = vcmask 326912  }
  0x15   :  { %1723 = vmatprep.mubr.msk.f32.mxu0 %vm61_vm0, %v35_v11  ;;  %v55_v31 = vld [vmem:[%s2771_s0 + $0xe0] sm:$0xff]  ;;  %v56_v32 = vld [vmem:[%s2771_s0 + $0xe8] sm:$0xff]  ;;  %v57_v33 = vld [vmem:[%s2771_s0 + $0xf0] sm:$0xff]  ;;  %455 = vst.msk [vmem:[#allocation3 + $0x38] sm:$0xff] %vm447_vm1, %v1970_v35  ;;  %vm603_vm7 = vcmask 392512   ;;  %vm610_vm8 = vcmask 458112  }
  0x16   :  { %v58_v34 = vld [vmem:[%s2771_s0 + $0xf8] sm:$0xff]  ;;  %456 = vst.msk [vmem:[#allocation3 + $0x40] sm:$0xff] %vm447_vm1, %v1970_v35  ;;  %457 = vst.msk [vmem:[#allocation3 + $0x48] sm:$0xff] %vm447_vm1, %v1970_v35  ;;  %v570_v36 = vld [vmem:[#allocation3 + $0x1] sm:$0xff]  ;;  %s1971_s0 = smov 8   ;;  %vm617_vm9 = vcmask 523712  }
  0x17   :  { %458 = vst.msk [vmem:[#allocation3 + $0x50] sm:$0xff] %vm447_vm1, %v1970_v35  ;;  %459 = vst.msk [vmem:[#allocation3 + $0x58] sm:$0xff] %vm447_vm1, %v1970_v35  ;;  %572 = vrot.lane.b32.xlu0 %v570_v36, %s1971_s0  ;;  %v577_v37 = vld [vmem:[#allocation3 + $0x2] sm:$0xff]  ;;  %vm624_vm10 = vcmask 589312   ;;  %vm2404_vm11 = vcmp.lt.s32.totalorder %v556_v38, 16  ;;  %vm2565_vm12 = vcmp.ge.s32.totalorder %v556_v38, 16 }
  0x18   :  { %1724 = vmatmul.mubr.msk.f32.gmra.mrb[8].mxu0 %vm61_vm0, %v36_v12  ;;  %460 = vst.msk [vmem:[#allocation3 + $0x60] sm:$0xff] %vm447_vm1, %v1970_v35  ;;  %560 = vst [vmem:[#allocation4] sm:$0xff] %v559_v41  ;;  %v568_v45 = vld [vmem:[#allocation3] sm:$0xff]  ;;  %vm2570_vm13 = vcmp.lt.s32.totalorder %v556_v38, 32  ;;  %vm2585_vm15 = vcmp.ge.s32.totalorder %v556_v38, 32  ;;  %vm2610_vm2 = vcmp.ge.s32.totalorder %v556_v38, 48 }
  0x19   :  { %1726 = vmatprep.mubr.msk.f32.mxu0 %vm61_vm0, %v37_v13  ;;  %561 = vst [vmem:[#allocation4 + $0x8] sm:$0xff] %v559_v41  ;;  %562 = vst [vmem:[#allocation4 + $0x10] sm:$0xff] %v559_v41 }
  0x1a   :  { %563 = vst [vmem:[#allocation4 + $0x18] sm:$0xff] %v559_v41  ;;  %564 = vst [vmem:[#allocation4 + $0x20] sm:$0xff] %v559_v41 }
  0x1b   :  { %579 = vrot.lane.b32.xlu0 %v577_v37, %s1972_s20  ;;  %565 = vst [vmem:[#allocation4 + $0x28] sm:$0xff] %v559_v41  ;;  %566 = vst [vmem:[#allocation4 + $0x30] sm:$0xff] %v559_v41 }
  0x1c   :  { %1727 = vmatmul.mubr.msk.f32.gmra.mrb[10].mxu0 %vm61_vm0, %v38_v14  ;;  %567 = vst [vmem:[#allocation4 + $0x38] sm:$0xff] %v559_v41  ;;  %569 = vst.msk [vmem:[#allocation4] sm:$0xff] %vm447_vm1, %v568_v45  ;;  %v987_v45 = vld [vmem:[%s2773_s2 + $0x18] sm:$0xff] }
  0x1d   :  { %1729 = vmatprep.mubr.msk.f32.mxu0 %vm61_vm0, %v39_v15  ;;  %vm2782_vm14 = vmand %vm2565_vm12, %vm2570_vm13 }
  0x1f   :  { %v958_v39 = vld [vmem:[#allocation3 + $0x5a] sm:$0xff] }
  0x20   :  { %1730 = vmatmul.mubr.msk.f32.gmra.mrb[12].mxu0 %vm61_vm0, %v40_v16  ;;  %960 = vrot.lane.b32.xlu0 %v958_v39, %s1973_s21 }
  0x21   :  { %1732 = vmatprep.mubr.msk.f32.mxu0 %vm61_vm0, %v41_v17 }
  0x24   :  { %1733 = vmatmul.mubr.msk.f32.gmra.mrb[14].mxu0 %vm61_vm0, %v42_v18 }
  0x25   :  { %1735 = vmatprep.mubr.msk.f32.mxu0 %vm61_vm0, %v43_v19 }
  0x28   :  { %1736 = vmatmul.mubr.msk.f32.gmra.mrb[16].mxu0 %vm61_vm0, %v44_v20 }
  0x29   :  { %1738 = vmatprep.mubr.msk.f32.mxu0 %vm61_vm0, %v45_v21 }
  0x2c   :  { %1739 = vmatmul.mubr.msk.f32.gmra.mrb[18].mxu0 %vm61_vm0, %v46_v22 }
  0x2d   :  { %1741 = vmatprep.mubr.msk.f32.mxu0 %vm61_vm0, %v47_v23 }
  0x30   :  { %1742 = vmatmul.mubr.msk.f32.gmra.mrb[20].mxu0 %vm61_vm0, %v48_v24 }
  0x31   :  { %1744 = vmatprep.mubr.msk.f32.mxu0 %vm61_vm0, %v49_v25 }
  0x34   :  { %1745 = vmatmul.mubr.msk.f32.gmra.mrb[22].mxu0 %vm61_vm0, %v50_v26 }
  0x35   :  { %1747 = vmatprep.mubr.msk.f32.mxu0 %vm61_vm0, %v51_v27 }
  0x38   :  { %1748 = vmatmul.mubr.msk.f32.gmra.mrb[24].mxu0 %vm61_vm0, %v52_v28 }
  0x39   :  { %1750 = vmatprep.mubr.msk.f32.mxu0 %vm61_vm0, %v53_v29 }
  0x3c   :  { %1751 = vmatmul.mubr.msk.f32.gmra.mrb[26].mxu0 %vm61_vm0, %v54_v30 }
  0x3d   :  { %1753 = vmatprep.mubr.msk.f32.mxu0 %vm61_vm0, %v55_v31  ;;  %v984_v31 = vld [vmem:[%s2773_s2] sm:$0xff] }
  0x40   :  { %1754 = vmatmul.mubr.msk.f32.gmra.mrb[28].mxu0 %vm61_vm0, %v56_v32  ;;  %v985_v32 = vld [vmem:[%s2773_s2 + $0x8] sm:$0xff] }
  0x41   :  { %1756 = vmatprep.mubr.msk.f32.mxu0 %vm61_vm0, %v57_v33  ;;  %v1842_v36 = vpack.c.bf16 %v985_v32, %v984_v31 }
  0x43   :  { %1843 = vmatprep.subr.bf16.mxu1 %v1842_v36 }
  0x44   :  { %1757 = vmatmul.mubr.msk.f32.gmra.mrb[30].mxu0 %vm61_vm0, %v58_v34  ;;  %1845 = vmatpush3.bf16.msra.mxu1 %v1842_v36  ;;  %vm2590_vm0 = vcmp.lt.s32.totalorder %v556_v38, 48 }
  0x89   :  { %v573_v47 = vpop.permute.xlu0 %572 }
  0x8a   :  { %576 = vst.msk [vmem:[#allocation4] sm:$0xff] %vm575_vm3, %v573_v47 }
  0x8d   :  { %v580_v52 = vpop.permute.xlu0 %579 }
  0x8e   :  { %583 = vst.msk [vmem:[#allocation4] sm:$0xff] %vm582_vm4, %v580_v52 }
  0xdb   :  { %v1713_v42 = vpop.f32.mrb[0].mxu0 }
  0xdc   :  { %v384_v43 = vmax.f32 %v1713_v42, 0.0  ;;  %v224_v44 = vpop.f32.mrb[1].mxu0 }
  0xdd   :  { %v383_v46 = vmax.f32 %v224_v44, 0.0  ;;  %v986_v44 = vld [vmem:[%s2773_s2 + $0x10] sm:$0xff] }
  0xde   :  { %416 = vst [vmem:[#allocation2 + $0x8] sm:$0xff] %v384_v43 }
  0xdf   :  { %415 = vst [vmem:[#allocation2] sm:$0xff] %v383_v46  ;;  %v1716_v48 = vpop.f32.mrb[2].mxu0 }
  0xe0   :  { %v386_v49 = vmax.f32 %v1716_v48, 0.0  ;;  %v234_v50 = vpop.f32.mrb[3].mxu0  ;;  %v1846_v48 = vpack.c.bf16 %v987_v45, %v986_v44 }
  0xe1   :  { %v385_v51 = vmax.f32 %v234_v50, 0.0 }
  0xe2   :  { %418 = vst [vmem:[#allocation2 + $0x18] sm:$0xff] %v386_v49  ;;  %1847 = vmatprep.subr.bf16.mxu1 %v1846_v48 }
  0xe3   :  { %417 = vst [vmem:[#allocation2 + $0x10] sm:$0xff] %v385_v51  ;;  %v1719_v53 = vpop.f32.mrb[4].mxu0  ;;  %1849 = vmatpush3.bf16.msra.mxu1 %v1846_v48 }
  0xe4   :  { %v388_v54 = vmax.f32 %v1719_v53, 0.0  ;;  %v244_v55 = vpop.f32.mrb[5].mxu0 }
  0xe5   :  { %v387_v56 = vmax.f32 %v244_v55, 0.0  ;;  %v988_v55 = vld [vmem:[%s2773_s2 + $0x20] sm:$0xff] }
  0xe6   :  { %420 = vst [vmem:[#allocation2 + $0x28] sm:$0xff] %v388_v54  ;;  %v461_v58 = vld [vmem:[#allocation2] ss:$2 sm:$0xff]  ;;  %v463_v59 = vld [vmem:[#allocation2 + $0x1] ss:$2 sm:$0xff] }
  0xe7   :  { %419 = vst [vmem:[#allocation2 + $0x20] sm:$0xff] %v387_v56  ;;  %v1722_v57 = vpop.f32.mrb[6].mxu0  ;;  %v468_v1 = vmax.f32 %v461_v58, %v463_v59  ;;  %v989_v56 = vld [vmem:[%s2773_s2 + $0x28] sm:$0xff] }
  0xe8   :  { %v390_v60 = vmax.f32 %v1722_v57, 0.0  ;;  %v254_v61 = vpop.f32.mrb[7].mxu0  ;;  %v1850_v59 = vpack.c.bf16 %v989_v56, %v988_v55 }
  0xe9   :  { %v389_v62 = vmax.f32 %v254_v61, 0.0 }
  0xea   :  { %v465_v63 = vld [vmem:[#allocation2 + $0x10] ss:$2 sm:$0xff]  ;;  %v467_v0 = vld [vmem:[#allocation2 + $0x11] ss:$2 sm:$0xff]  ;;  %422 = vst [vmem:[#allocation2 + $0x38] sm:$0xff] %v390_v60  ;;  %1851 = vmatprep.subr.bf16.mxu1 %v1850_v59 }
  0xeb   :  { %v469_v2 = vmax.f32 %v465_v63, %v467_v0  ;;  %421 = vst [vmem:[#allocation2 + $0x30] sm:$0xff] %v389_v62  ;;  %v1725_v3 = vpop.f32.mrb[8].mxu0  ;;  %1853 = vmatpush3.bf16.msra.mxu1 %v1850_v59 }
  0xec   :  { %v392_v4 = vmax.f32 %v1725_v3, 0.0  ;;  %v264_v5 = vpop.f32.mrb[9].mxu0  ;;  %v990_v3 = vld [vmem:[%s2773_s2 + $0x30] sm:$0xff] }
  0xed   :  { %v470_v6 = vmax.f32 %v468_v1, %v469_v2  ;;  %v391_v7 = vmax.f32 %v264_v5, 0.0 }
  0xee   :  { %v473_v8 = vld [vmem:[#allocation2 + $0x20] ss:$2 sm:$0xff]  ;;  %v475_v9 = vld [vmem:[#allocation2 + $0x21] ss:$2 sm:$0xff]  ;;  %424 = vst [vmem:[#allocation2 + $0x48] sm:$0xff] %v392_v4  ;;  %v991_v4 = vld [vmem:[%s2773_s2 + $0x38] sm:$0xff] }
  0xef   :  { %471 = vst.msk [vmem:[#allocation3 + $0xb] sm:$0xff] %vm447_vm1, %v470_v6  ;;  %423 = vst [vmem:[#allocation2 + $0x40] sm:$0xff] %v391_v7  ;;  %v1728_v10 = vpop.f32.mrb[10].mxu0  ;;  %v480_v13 = vmax.f32 %v473_v8, %v475_v9  ;;  %v1854_v7 = vpack.c.bf16 %v991_v4, %v990_v3 }
  0xf0   :  { %v394_v11 = vmax.f32 %v1728_v10, 0.0  ;;  %v274_v12 = vpop.f32.mrb[11].mxu0 }
  0xf1   :  { %v393_v14 = vmax.f32 %v274_v12, 0.0  ;;  %1855 = vmatprep.subr.bf16.mxu1 %v1854_v7 }
  0xf2   :  { %v477_v15 = vld [vmem:[#allocation2 + $0x30] ss:$2 sm:$0xff]  ;;  %v479_v16 = vld [vmem:[#allocation2 + $0x31] ss:$2 sm:$0xff]  ;;  %426 = vst [vmem:[#allocation2 + $0x58] sm:$0xff] %v394_v11  ;;  %1857 = vmatpush3.bf16.msra.mxu1 %v1854_v7 }
  0xf3   :  { %v481_v17 = vmax.f32 %v477_v15, %v479_v16  ;;  %425 = vst [vmem:[#allocation2 + $0x50] sm:$0xff] %v393_v14  ;;  %v1731_v18 = vpop.f32.mrb[12].mxu0  ;;  %v992_v14 = vld [vmem:[%s2773_s2 + $0x40] sm:$0xff]  ;;  %v993_v15 = vld [vmem:[%s2773_s2 + $0x48] sm:$0xff] }
  0xf4   :  { %v396_v19 = vmax.f32 %v1731_v18, 0.0  ;;  %v284_v20 = vpop.f32.mrb[13].mxu0  ;;  %v1858_v18 = vpack.c.bf16 %v993_v15, %v992_v14 }
  0xf5   :  { %v482_v21 = vmax.f32 %v480_v13, %v481_v17  ;;  %v395_v22 = vmax.f32 %v284_v20, 0.0 }
  0xf6   :  { %v485_v23 = vld [vmem:[#allocation2 + $0x40] ss:$2 sm:$0xff]  ;;  %v487_v24 = vld [vmem:[#allocation2 + $0x41] ss:$2 sm:$0xff]  ;;  %428 = vst [vmem:[#allocation2 + $0x68] sm:$0xff] %v396_v19  ;;  %1859 = vmatprep.subr.bf16.mxu1 %v1858_v18 }
  0xf7   :  { %v2195_v25 = vld [vmem:[#allocation3 + $0xc] sm:$0xff]  ;;  %483 = vst.msk [vmem:[#allocation3 + $0x15] sm:$0xff] %vm447_vm1, %v482_v21  ;;  %427 = vst [vmem:[#allocation2 + $0x60] sm:$0xff] %v395_v22  ;;  %v1734_v28 = vpop.f32.mrb[14].mxu0  ;;  %v492_v33 = vmax.f32 %v485_v23, %v487_v24  ;;  %1861 = vmatpush3.bf16.msra.mxu1 %v1858_v18 }
  0xf8   :  { %636 = vrot.lane.b32.xlu0 %v2195_v25, %s1972_s20  ;;  %v628_v26 = vld [vmem:[#allocation3 + $0xb] sm:$0xff]  ;;  %v398_v29 = vmax.f32 %v1734_v28, 0.0  ;;  %v294_v30 = vpop.f32.mrb[15].mxu0 }
  0xf9   :  { %v584_v27 = vld [vmem:[#allocation3 + $0xa] sm:$0xff]  ;;  %630 = vrot.lane.b32.xlu1 %v628_v26, %s1971_s0  ;;  %v397_v34 = vmax.f32 %v294_v30, 0.0 }
  0xfa   :  { %627 = vst.msk [vmem:[#allocation4 + $0x8] sm:$0xff] %vm447_vm1, %v584_v27  ;;  %v489_v37 = vld [vmem:[#allocation2 + $0x50] ss:$2 sm:$0xff]  ;;  %v491_v39 = vld [vmem:[#allocation2 + $0x51] ss:$2 sm:$0xff]  ;;  %430 = vst [vmem:[#allocation2 + $0x78] sm:$0xff] %v398_v29 }
  0xfb   :  { %v493_v40 = vmax.f32 %v489_v37, %v491_v39  ;;  %429 = vst [vmem:[#allocation2 + $0x70] sm:$0xff] %v397_v34  ;;  %v1737_v41 = vpop.f32.mrb[16].mxu0 }
  0xfc   :  { %v400_v42 = vmax.f32 %v1737_v41, 0.0  ;;  %v304_v43 = vpop.f32.mrb[17].mxu0  ;;  %v997_v41 = vld [vmem:[%s2773_s2 + $0x68] sm:$0xff] }
  0xfd   :  { %586 = vrot.lane.b32.xlu1 %v584_v27, %s1974_s26  ;;  %v494_v46 = vmax.f32 %v492_v33, %v493_v40  ;;  %v399_v47 = vmax.f32 %v304_v43, 0.0  ;;  %v995_v27 = vld [vmem:[%s2773_s2 + $0x58] sm:$0xff]  ;;  %v996_v40 = vld [vmem:[%s2773_s2 + $0x60] sm:$0xff] }
  0xfe   :  { %v640_v49 = vld [vmem:[#allocation3 + $0x14] sm:$0xff]  ;;  %v497_v50 = vld [vmem:[#allocation2 + $0x60] ss:$2 sm:$0xff]  ;;  %432 = vst [vmem:[#allocation2 + $0x88] sm:$0xff] %v400_v42  ;;  %v499_v51 = vld [vmem:[#allocation2 + $0x61] ss:$2 sm:$0xff]  ;;  %v1866_v44 = vpack.c.bf16 %v997_v41, %v996_v40 }
  0xff   :  { %495 = vst.msk [vmem:[#allocation3 + $0x1f] sm:$0xff] %vm447_vm1, %v494_v46  ;;  %642 = vrot.lane.b32.xlu0 %v640_v49, %s1974_s26  ;;  %431 = vst [vmem:[#allocation2 + $0x80] sm:$0xff] %v399_v47  ;;  %v1740_v52 = vpop.f32.mrb[18].mxu0  ;;  %v504_v57 = vmax.f32 %v497_v50, %v499_v51  ;;  %v646_v60 = vld [vmem:[#allocation3 + $0x15] sm:$0xff] }
 0x100   :  { %677 = vst.msk [vmem:[#allocation4 + $0x10] sm:$0xff] %vm447_vm1, %v640_v49  ;;  %v402_v53 = vmax.f32 %v1740_v52, 0.0  ;;  %v314_v54 = vpop.f32.mrb[19].mxu0  ;;  %v652_v19 = vld [vmem:[#allocation3 + $0x16] sm:$0xff] }
 0x101   :  { %593 = vrot.lane.b32.xlu1 %v628_v26, %s1975_s8  ;;  %v401_v58 = vmax.f32 %v314_v54, 0.0  ;;  %v994_v26 = vld [vmem:[%s2773_s2 + $0x50] sm:$0xff]  ;;  %v999_v52 = vld [vmem:[%s2773_s2 + $0x78] sm:$0xff] }
 0x102   :  { %v501_v61 = vld [vmem:[#allocation2 + $0x70] ss:$2 sm:$0xff]  ;;  %v503_v62 = vld [vmem:[#allocation2 + $0x71] ss:$2 sm:$0xff]  ;;  %434 = vst [vmem:[#allocation2 + $0x98] sm:$0xff] %v402_v53  ;;  %v1862_v30 = vpack.c.bf16 %v995_v27, %v994_v26 }
 0x103   :  { %648 = vrot.lane.b32.xlu0 %v646_v60, %s1975_s8  ;;  %v505_v63 = vmax.f32 %v501_v61, %v503_v62  ;;  %433 = vst [vmem:[#allocation2 + $0x90] sm:$0xff] %v401_v58  ;;  %v1743_v0 = vpop.f32.mrb[20].mxu0  ;;  %v998_v51 = vld [vmem:[%s2773_s2 + $0x70] sm:$0xff]  ;;  %v964_v26 = vld [vmem:[#allocation3 + $0x5b] sm:$0xff]  ;;  %s1980_s2 = smov 80  }
 0x104   :  { %v404_v1 = vmax.f32 %v1743_v0, 0.0  ;;  %v324_v2 = vpop.f32.mrb[21].mxu0  ;;  %1863 = vmatprep.subr.bf16.mxu1 %v1862_v30  ;;  %v1870_v55 = vpack.c.bf16 %v999_v52, %v998_v51 }
 0x105   :  { %600 = vrot.lane.b32.xlu1 %v2195_v25, %s1976_s12  ;;  %v506_v5 = vmax.f32 %v504_v57, %v505_v63  ;;  %v403_v6 = vmax.f32 %v324_v2, 0.0  ;;  %1865 = vmatpush3.bf16.msra.mxu1 %v1862_v30 }
 0x106   :  { %v509_v8 = vld [vmem:[#allocation2 + $0x80] ss:$2 sm:$0xff]  ;;  %v511_v9 = vld [vmem:[#allocation2 + $0x81] ss:$2 sm:$0xff]  ;;  %436 = vst [vmem:[#allocation2 + $0xa8] sm:$0xff] %v404_v1  ;;  %1867 = vmatprep.subr.bf16.mxu1 %v1866_v44 }
 0x107   :  { %607 = vrot.lane.b32.xlu0 %v640_v49, %s1973_s21  ;;  %507 = vst.msk [vmem:[#allocation3 + $0x29] sm:$0xff] %vm447_vm1, %v506_v5  ;;  %v2236_v10 = vld [vmem:[#allocation3 + $0x1e] sm:$0xff]  ;;  %435 = vst [vmem:[#allocation2 + $0xa0] sm:$0xff] %v403_v6  ;;  %v1746_v11 = vpop.f32.mrb[22].mxu0  ;;  %v516_v16 = vmax.f32 %v509_v8, %v511_v9 }
 0x108   :  { %v406_v12 = vmax.f32 %v1746_v11, 0.0  ;;  %v334_v13 = vpop.f32.mrb[23].mxu0  ;;  %727 = vst.msk [vmem:[#allocation4 + $0x18] sm:$0xff] %vm447_vm1, %v2236_v10  ;;  %v728_v33 = vld [vmem:[#allocation3 + $0x1f] sm:$0xff] }
 0x109   :  { %680 = vrot.lane.b32.xlu1 %v646_v60, %s1971_s0  ;;  %v405_v17 = vmax.f32 %v334_v13, 0.0  ;;  %1869 = vmatpush3.bf16.msra.mxu1 %v1866_v44  ;;  %v734_v58 = vld [vmem:[#allocation3 + $0x20] sm:$0xff] }
 0x10a   :  { %v513_v20 = vld [vmem:[#allocation2 + $0x90] ss:$2 sm:$0xff]  ;;  %v515_v21 = vld [vmem:[#allocation2 + $0x91] ss:$2 sm:$0xff]  ;;  %438 = vst [vmem:[#allocation2 + $0xb8] sm:$0xff] %v406_v12  ;;  %1871 = vmatprep.subr.bf16.mxu1 %v1870_v55 }
 0x10b   :  { %686 = vrot.lane.b32.xlu0 %v652_v19, %s1972_s20  ;;  %v517_v22 = vmax.f32 %v513_v20, %v515_v21  ;;  %437 = vst [vmem:[#allocation2 + $0xb0] sm:$0xff] %v405_v17  ;;  %v1749_v23 = vpop.f32.mrb[24].mxu0 }
 0x10c   :  { %v408_v24 = vmax.f32 %v1749_v23, 0.0  ;;  %v344_v25 = vpop.f32.mrb[25].mxu0 }
 0x10d   :  { %654 = vrot.lane.b32.xlu1 %v652_v19, %s1976_s12  ;;  %v518_v28 = vmax.f32 %v516_v16, %v517_v22  ;;  %v407_v29 = vmax.f32 %v344_v25, 0.0  ;;  %1873 = vmatpush3.bf16.msra.mxu1 %v1870_v55 }
 0x10e   :  { %v2255_v31 = vld [vmem:[#allocation3 + $0x28] sm:$0xff]  ;;  %440 = vst [vmem:[#allocation2 + $0xc8] sm:$0xff] %v408_v24  ;;  %v2325_v24 = vpop.permute.xlu0 %960 }
 0x10f   :  { %v521_v32 = vld [vmem:[#allocation2 + $0xa0] ss:$2 sm:$0xff]  ;;  %614 = vrot.lane.b32.xlu0 %v646_v60, %s1977_s28  ;;  %519 = vst.msk [vmem:[#allocation3 + $0x33] sm:$0xff] %vm447_vm1, %v518_v28  ;;  %v523_v34 = vld [vmem:[#allocation2 + $0xa1] ss:$2 sm:$0xff]  ;;  %439 = vst [vmem:[#allocation2 + $0xc0] sm:$0xff] %v407_v29 }
 0x110   :  { %v1752_v36 = vpop.f32.mrb[26].mxu0  ;;  %777 = vst.msk [vmem:[#allocation4 + $0x20] sm:$0xff] %vm447_vm1, %v2255_v31  ;;  %v528_v42 = vmax.f32 %v521_v32, %v523_v34  ;;  %v746_v9 = vld [vmem:[#allocation3 + $0x29] sm:$0xff] }
 0x111   :  { %730 = vrot.lane.b32.xlu1 %v728_v33, %s1971_s0  ;;  %v410_v37 = vmax.f32 %v1752_v36, 0.0  ;;  %v354_v39 = vpop.f32.mrb[27].mxu0  ;;  %v752_v15 = vld [vmem:[#allocation3 + $0x2a] sm:$0xff] }
 0x112   :  { %v409_v43 = vmax.f32 %v354_v39, 0.0  ;;  %v525_v45 = vld [vmem:[#allocation2 + $0xb0] ss:$2 sm:$0xff]  ;;  %v527_v46 = vld [vmem:[#allocation2 + $0xb1] ss:$2 sm:$0xff] }
 0x113   :  { %442 = vst [vmem:[#allocation2 + $0xd8] sm:$0xff] %v410_v37  ;;  %621 = vrot.lane.b32.xlu0 %v652_v19, %s1978_s1  ;;  %v529_v47 = vmax.f32 %v525_v45, %v527_v46  ;;  %v1755_v48 = vpop.f32.mrb[28].mxu0 }
 0x114   :  { %441 = vst [vmem:[#allocation2 + $0xd0] sm:$0xff] %v409_v43  ;;  %v412_v49 = vmax.f32 %v1755_v48, 0.0  ;;  %v364_v50 = vpop.f32.mrb[29].mxu0 }
 0x115   :  { %660 = vrot.lane.b32.xlu1 %v2236_v10, %s1973_s21  ;;  %v530_v53 = vmax.f32 %v528_v42, %v529_v47  ;;  %v411_v54 = vmax.f32 %v364_v50, 0.0 }
 0x116   :  { %v533_v56 = vld [vmem:[#allocation2 + $0xc0] ss:$2 sm:$0xff]  ;;  %v535_v57 = vld [vmem:[#allocation2 + $0xc1] ss:$2 sm:$0xff]  ;;  %444 = vst [vmem:[#allocation2 + $0xe8] sm:$0xff] %v412_v49  ;;  %v758_v59 = vld [vmem:[#allocation3 + $0x32] sm:$0xff] }
 0x117   :  { %692 = vrot.lane.b32.xlu0 %v2236_v10, %s1974_s26  ;;  %531 = vst.msk [vmem:[#allocation3 + $0x3d] sm:$0xff] %vm447_vm1, %v530_v53  ;;  %443 = vst [vmem:[#allocation2 + $0xe0] sm:$0xff] %v411_v54  ;;  %v1758_v60 = vpop.f32.mrb[30].mxu0  ;;  %v540_v63 = vmax.f32 %v533_v56, %v535_v57  ;;  %v828_v16 = vld [vmem:[#allocation3 + $0x33] sm:$0xff] }
 0x118   :  { %v414_v61 = vmax.f32 %v1758_v60, 0.0  ;;  %v374_v62 = vpop.f32.mrb[31].mxu0  ;;  %827 = vst.msk [vmem:[#allocation4 + $0x28] sm:$0xff] %vm447_vm1, %v758_v59  ;;  %v834_v17 = vld [vmem:[#allocation3 + $0x34] sm:$0xff] }
 0x119   :  { %736 = vrot.lane.b32.xlu1 %v734_v58, %s1972_s20  ;;  %v413_v0 = vmax.f32 %v374_v62, 0.0 }
 0x11a   :  { %446 = vst [vmem:[#allocation2 + $0xf8] sm:$0xff] %v414_v61 }
 0x11b   :  { %v537_v1 = vld [vmem:[#allocation2 + $0xd0] ss:$2 sm:$0xff]  ;;  %v539_v2 = vld [vmem:[#allocation2 + $0xd1] ss:$2 sm:$0xff]  ;;  %698 = vrot.lane.b32.xlu0 %v728_v33, %s1975_s8  ;;  %445 = vst [vmem:[#allocation2 + $0xf0] sm:$0xff] %v413_v0 }
 0x11c   :  { %v541_v3 = vmax.f32 %v537_v1, %v539_v2 }
 0x11d   :  { %666 = vrot.lane.b32.xlu1 %v728_v33, %s1977_s28 }
 0x11e   :  { %v542_v4 = vmax.f32 %v540_v63, %v541_v3  ;;  %v840_v5 = vld [vmem:[#allocation3 + $0x3c] sm:$0xff] }
 0x11f   :  { %v545_v6 = vld [vmem:[#allocation2 + $0xe0] ss:$2 sm:$0xff]  ;;  %672 = vrot.lane.b32.xlu0 %v734_v58, %s1978_s1  ;;  %v547_v7 = vld [vmem:[#allocation2 + $0xe1] ss:$2 sm:$0xff]  ;;  %877 = vst.msk [vmem:[#allocation4 + $0x30] sm:$0xff] %vm447_vm1, %v840_v5 }
 0x120   :  { %543 = vst.msk [vmem:[#allocation3 + $0x47] sm:$0xff] %vm447_vm1, %v542_v4  ;;  %v552_v8 = vmax.f32 %v545_v6, %v547_v7  ;;  %v846_v18 = vld [vmem:[#allocation3 + $0x3d] sm:$0xff] }
 0x121   :  { %704 = vrot.lane.b32.xlu1 %v734_v58, %s1976_s12  ;;  %v852_v19 = vld [vmem:[#allocation3 + $0x3e] sm:$0xff] }
 0x122   :  { %v549_v10 = vld [vmem:[#allocation2 + $0xf0] ss:$2 sm:$0xff]  ;;  %v551_v11 = vld [vmem:[#allocation2 + $0xf1] ss:$2 sm:$0xff] }
 0x123   :  { %748 = vrot.lane.b32.xlu0 %v746_v9, %s1975_s8  ;;  %v553_v12 = vmax.f32 %v549_v10, %v551_v11 }
 0x125   :  { %742 = vrot.lane.b32.xlu1 %v2255_v31, %s1974_s26  ;;  %v554_v13 = vmax.f32 %v552_v8, %v553_v12 }
 0x127   :  { %v858_v14 = vld [vmem:[#allocation3 + $0x46] sm:$0xff]  ;;  %710 = vrot.lane.b32.xlu0 %v2255_v31, %s1973_s21  ;;  %555 = vst.msk [vmem:[#allocation3 + $0x51] sm:$0xff] %vm447_vm1, %v554_v13  ;;  %v970_v31 = vld [vmem:[#allocation3 + $0x5c] sm:$0xff] }
 0x128   :  { %927 = vst.msk [vmem:[#allocation4 + $0x38] sm:$0xff] %vm447_vm1, %v858_v14  ;;  %v928_v20 = vld [vmem:[#allocation3 + $0x47] sm:$0xff]  ;;  %vm2781_vm1 = vmand %vm2585_vm15, %vm2590_vm0 }
 0x129   :  { %780 = vrot.lane.b32.xlu1 %v746_v9, %s1971_s0  ;;  %v934_v21 = vld [vmem:[#allocation3 + $0x48] sm:$0xff] }
 0x12b   :  { %786 = vrot.lane.b32.xlu0 %v752_v15, %s1972_s20 }
 0x12d   :  { %754 = vrot.lane.b32.xlu1 %v752_v15, %s1976_s12 }
 0x12e   :  { %v946_v22 = vld [vmem:[#allocation3 + $0x51] sm:$0xff] }
 0x12f   :  { %716 = vrot.lane.b32.xlu0 %v746_v9, %s1977_s28  ;;  %v940_v23 = vld [vmem:[#allocation3 + $0x50] sm:$0xff] }
 0x130   :  { %v952_v25 = vld [vmem:[#allocation3 + $0x52] sm:$0xff] }
 0x131   :  { %830 = vrot.lane.b32.xlu1 %v828_v16, %s1971_s0 }
 0x133   :  { %722 = vrot.lane.b32.xlu0 %v752_v15, %s1978_s1 }
 0x135   :  { %760 = vrot.lane.b32.xlu1 %v758_v59, %s1973_s21 }
 0x137   :  { %792 = vrot.lane.b32.xlu0 %v758_v59, %s1974_s26 }
 0x139   :  { %836 = vrot.lane.b32.xlu1 %v834_v17, %s1972_s20 }
 0x13b   :  { %798 = vrot.lane.b32.xlu0 %v828_v16, %s1975_s8 }
 0x13d   :  { %766 = vrot.lane.b32.xlu1 %v828_v16, %s1977_s28 }
 0x13f   :  { %772 = vrot.lane.b32.xlu0 %v834_v17, %s1978_s1 }
 0x141   :  { %804 = vrot.lane.b32.xlu1 %v834_v17, %s1976_s12 }
 0x143   :  { %848 = vrot.lane.b32.xlu0 %v846_v18, %s1975_s8 }
 0x145   :  { %842 = vrot.lane.b32.xlu1 %v840_v5, %s1974_s26 }
 0x147   :  { %810 = vrot.lane.b32.xlu0 %v840_v5, %s1973_s21 }
 0x149   :  { %880 = vrot.lane.b32.xlu1 %v846_v18, %s1971_s0 }
 0x14b   :  { %886 = vrot.lane.b32.xlu0 %v852_v19, %s1972_s20 }
 0x14d   :  { %854 = vrot.lane.b32.xlu1 %v852_v19, %s1976_s12 }
 0x14f   :  { %816 = vrot.lane.b32.xlu0 %v846_v18, %s1977_s28 }
 0x151   :  { %930 = vrot.lane.b32.xlu1 %v928_v20, %s1971_s0  ;;  %s1981_s0 = smov 96  }
 0x153   :  { %822 = vrot.lane.b32.xlu0 %v852_v19, %s1978_s1 }
 0x155   :  { %860 = vrot.lane.b32.xlu1 %v858_v14, %s1973_s21 }
 0x157   :  { %892 = vrot.lane.b32.xlu0 %v858_v14, %s1974_s26 }
 0x159   :  { %936 = vrot.lane.b32.xlu1 %v934_v21, %s1972_s20 }
 0x15b   :  { %898 = vrot.lane.b32.xlu0 %v928_v20, %s1975_s8 }
 0x15d   :  { %866 = vrot.lane.b32.xlu1 %v928_v20, %s1977_s28 }
 0x15f   :  { %872 = vrot.lane.b32.xlu0 %v934_v21, %s1978_s1 }
 0x161   :  { %904 = vrot.lane.b32.xlu1 %v934_v21, %s1976_s12 }
 0x163   :  { %948 = vrot.lane.b32.xlu0 %v946_v22, %s1975_s8 }
 0x165   :  { %942 = vrot.lane.b32.xlu1 %v940_v23, %s1974_s26  ;;  %s1982_s26 = smov 112  }
 0x167   :  { %954 = vrot.lane.b32.xlu0 %v952_v25, %s1976_s12 }
 0x169   :  { %910 = vrot.lane.b32.xlu1 %v940_v23, %s1973_s21 }
 0x16a   :  { %v637_v27 = vpop.permute.xlu0 %636 }
 0x16b   :  { %v631_v28 = vpop.permute.xlu1 %630  ;;  %966 = vrot.lane.b32.xlu0 %v964_v26, %s1977_s28 }
 0x16c   :  { %633 = vst.msk [vmem:[#allocation4 + $0x8] sm:$0xff] %vm575_vm3, %v631_v28 }
 0x16d   :  { %639 = vst.msk [vmem:[#allocation4 + $0x8] sm:$0xff] %vm582_vm4, %v637_v27  ;;  %916 = vrot.lane.b32.xlu1 %v946_v22, %s1977_s28 }
 0x16f   :  { %v587_v29 = vpop.permute.xlu1 %586 }
 0x170   :  { %590 = vst.msk [vmem:[#allocation4] sm:$0xff] %vm589_vm5, %v587_v29 }
 0x171   :  { %922 = vrot.lane.b32.xlu1 %v952_v25, %s1978_s1  ;;  %v643_v30 = vpop.permute.xlu0 %642 }
 0x172   :  { %645 = vst.msk [vmem:[#allocation4 + $0x8] sm:$0xff] %vm589_vm5, %v643_v30 }
 0x173   :  { %v594_v32 = vpop.permute.xlu1 %593 }
 0x174   :  { %597 = vst.msk [vmem:[#allocation4] sm:$0xff] %vm596_vm6, %v594_v32 }
 0x175   :  { %972 = vrot.lane.b32.xlu1 %v970_v31, %s1978_s1  ;;  %v649_v33 = vpop.permute.xlu0 %648 }
 0x176   :  { %651 = vst.msk [vmem:[#allocation4 + $0x8] sm:$0xff] %vm596_vm6, %v649_v33 }
 0x177   :  { %v601_v34 = vpop.permute.xlu1 %600 }
 0x178   :  { %604 = vst.msk [vmem:[#allocation4] sm:$0xff] %vm603_vm7, %v601_v34 }
 0x179   :  { %v608_v36 = vpop.permute.xlu0 %607 }
 0x17a   :  { %611 = vst.msk [vmem:[#allocation4] sm:$0xff] %vm610_vm8, %v608_v36 }
 0x17b   :  { %v681_v37 = vpop.permute.xlu1 %680 }
 0x17c   :  { %683 = vst.msk [vmem:[#allocation4 + $0x10] sm:$0xff] %vm575_vm3, %v681_v37 }
 0x17d   :  { %v687_v39 = vpop.permute.xlu0 %686 }
 0x17e   :  { %689 = vst.msk [vmem:[#allocation4 + $0x10] sm:$0xff] %vm582_vm4, %v687_v39 }
 0x17f   :  { %v655_v40 = vpop.permute.xlu1 %654 }
 0x180   :  { %657 = vst.msk [vmem:[#allocation4 + $0x8] sm:$0xff] %vm603_vm7, %v655_v40 }
 0x181   :  { %v615_v41 = vpop.permute.xlu0 %614 }
 0x182   :  { %618 = vst.msk [vmem:[#allocation4] sm:$0xff] %vm617_vm9, %v615_v41  ;;  %v1979_v41 = vmov 1966171168  }
 0x183   :  { %v731_v42 = vpop.permute.xlu1 %730 }
 0x184   :  { %733 = vst.msk [vmem:[#allocation4 + $0x18] sm:$0xff] %vm575_vm3, %v731_v42  ;;  %v1138_v42 = vunpack.c.l.s4 %v1979_v41 }
 0x185   :  { %v622_v43 = vpop.permute.xlu0 %621 }
 0x186   :  { %625 = vst.msk [vmem:[#allocation4] sm:$0xff] %vm624_vm10, %v622_v43  ;;  %v1139_v43 = vunpack.c.0.s8 %v1138_v42 }
 0x187   :  { %v661_v44 = vpop.permute.xlu1 %660 }
 0x188   :  { %663 = vst.msk [vmem:[#allocation4 + $0x8] sm:$0xff] %vm610_vm8, %v661_v44  ;;  %v2398_v44 = vshrl.u32 %v556_v38, 7 }
 0x189   :  { %v693_v45 = vpop.permute.xlu0 %692 }
 0x18a   :  { %695 = vst.msk [vmem:[#allocation4 + $0x10] sm:$0xff] %vm589_vm5, %v693_v45 }
 0x18b   :  { %v737_v46 = vpop.permute.xlu1 %736 }
 0x18c   :  { %739 = vst.msk [vmem:[#allocation4 + $0x18] sm:$0xff] %vm582_vm4, %v737_v46 }
 0x18d   :  { %v699_v47 = vpop.permute.xlu0 %698  ;;  %v976_v48 = vld [vmem:[#allocation4] sm:$0xff] }
 0x18e   :  { %701 = vst.msk [vmem:[#allocation4 + $0x10] sm:$0xff] %vm596_vm6, %v699_v47  ;;  %1791 = vmatprep.mubr.f32.mxu1 %v976_v48 }
 0x18f   :  { %v667_v49 = vpop.permute.xlu1 %666 }
 0x190   :  { %669 = vst.msk [vmem:[#allocation4 + $0x8] sm:$0xff] %vm617_vm9, %v667_v49 }
 0x191   :  { %v673_v50 = vpop.permute.xlu0 %672 }
 0x192   :  { %675 = vst.msk [vmem:[#allocation4 + $0x8] sm:$0xff] %vm624_vm10, %v673_v50 }
 0x193   :  { %v705_v51 = vpop.permute.xlu1 %704 }
 0x194   :  { %707 = vst.msk [vmem:[#allocation4 + $0x10] sm:$0xff] %vm603_vm7, %v705_v51  ;;  %v2401_v51 = vsub.s32 %v1139_v43, %v2398_v44 }
 0x195   :  { %v749_v52 = vpop.permute.xlu0 %748 }
 0x197   :  { %v743_v53 = vpop.permute.xlu1 %742 }
 0x198   :  { %745 = vst.msk [vmem:[#allocation4 + $0x18] sm:$0xff] %vm589_vm5, %v743_v53 }
 0x199   :  { %751 = vst.msk [vmem:[#allocation4 + $0x18] sm:$0xff] %vm596_vm6, %v749_v52  ;;  %v711_v54 = vpop.permute.xlu0 %710  ;;  %v977_v55 = vld [vmem:[#allocation4 + $0x8] sm:$0xff]  ;;  %v1352_v52 = vld [vmem:[%s2774_s3 + $0x20] sm:$0xff] }
 0x19a   :  { %713 = vst.msk [vmem:[#allocation4 + $0x10] sm:$0xff] %vm610_vm8, %v711_v54  ;;  %1792 = vmatmul.mubr.f32.vlgmr.msra.gmra.mrb[0].mxu1 %v977_v55 }
 0x19b   :  { %v781_v56 = vpop.permute.xlu1 %780 }
 0x19c   :  { %783 = vst.msk [vmem:[#allocation4 + $0x20] sm:$0xff] %vm575_vm3, %v781_v56 }
 0x19d   :  { %v787_v57 = vpop.permute.xlu0 %786 }
 0x19e   :  { %789 = vst.msk [vmem:[#allocation4 + $0x20] sm:$0xff] %vm582_vm4, %v787_v57 }
 0x19f   :  { %v755_v58 = vpop.permute.xlu1 %754 }
 0x1a0   :  { %757 = vst.msk [vmem:[#allocation4 + $0x18] sm:$0xff] %vm603_vm7, %v755_v58 }
 0x1a1   :  { %v717_v59 = vpop.permute.xlu0 %716 }
 0x1a2   :  { %719 = vst.msk [vmem:[#allocation4 + $0x10] sm:$0xff] %vm617_vm9, %v717_v59 }
 0x1a3   :  { %v831_v60 = vpop.permute.xlu1 %830 }
 0x1a4   :  { %833 = vst.msk [vmem:[#allocation4 + $0x28] sm:$0xff] %vm575_vm3, %v831_v60 }
 0x1a5   :  { %v723_v61 = vpop.permute.xlu0 %722 }
 0x1a6   :  { %725 = vst.msk [vmem:[#allocation4 + $0x10] sm:$0xff] %vm624_vm10, %v723_v61 }
 0x1a7   :  { %v761_v62 = vpop.permute.xlu1 %760 }
 0x1a8   :  { %763 = vst.msk [vmem:[#allocation4 + $0x18] sm:$0xff] %vm610_vm8, %v761_v62 }
 0x1a9   :  { %v793_v63 = vpop.permute.xlu0 %792 }
 0x1aa   :  { %795 = vst.msk [vmem:[#allocation4 + $0x20] sm:$0xff] %vm589_vm5, %v793_v63 }
 0x1ab   :  { %v837_v0 = vpop.permute.xlu1 %836 }
 0x1ac   :  { %839 = vst.msk [vmem:[#allocation4 + $0x28] sm:$0xff] %vm582_vm4, %v837_v0 }
 0x1ad   :  { %v799_v1 = vpop.permute.xlu0 %798  ;;  %v978_v2 = vld [vmem:[#allocation4 + $0x10] sm:$0xff] }
 0x1ae   :  { %801 = vst.msk [vmem:[#allocation4 + $0x20] sm:$0xff] %vm596_vm6, %v799_v1  ;;  %1794 = vmatprep.mubr.f32.mxu1 %v978_v2 }
 0x1af   :  { %v767_v3 = vpop.permute.xlu1 %766 }
 0x1b0   :  { %769 = vst.msk [vmem:[#allocation4 + $0x18] sm:$0xff] %vm617_vm9, %v767_v3 }
 0x1b1   :  { %v773_v4 = vpop.permute.xlu0 %772 }
 0x1b2   :  { %775 = vst.msk [vmem:[#allocation4 + $0x18] sm:$0xff] %vm624_vm10, %v773_v4 }
 0x1b3   :  { %v805_v5 = vpop.permute.xlu1 %804 }
 0x1b4   :  { %807 = vst.msk [vmem:[#allocation4 + $0x20] sm:$0xff] %vm603_vm7, %v805_v5 }
 0x1b5   :  { %v849_v6 = vpop.permute.xlu0 %848 }
 0x1b7   :  { %v843_v7 = vpop.permute.xlu1 %842 }
 0x1b8   :  { %845 = vst.msk [vmem:[#allocation4 + $0x28] sm:$0xff] %vm589_vm5, %v843_v7 }
 0x1b9   :  { %851 = vst.msk [vmem:[#allocation4 + $0x28] sm:$0xff] %vm596_vm6, %v849_v6  ;;  %v811_v8 = vpop.permute.xlu0 %810  ;;  %v979_v9 = vld [vmem:[#allocation4 + $0x18] sm:$0xff] }
 0x1ba   :  { %813 = vst.msk [vmem:[#allocation4 + $0x20] sm:$0xff] %vm610_vm8, %v811_v8  ;;  %1795 = vmatmul.mubr.f32.gmra.mrb[2].mxu1 %v979_v9 }
 0x1bb   :  { %v881_v10 = vpop.permute.xlu1 %880 }
 0x1bc   :  { %883 = vst.msk [vmem:[#allocation4 + $0x30] sm:$0xff] %vm575_vm3, %v881_v10 }
 0x1bd   :  { %v887_v11 = vpop.permute.xlu0 %886 }
 0x1be   :  { %889 = vst.msk [vmem:[#allocation4 + $0x30] sm:$0xff] %vm582_vm4, %v887_v11 }
 0x1bf   :  { %v855_v12 = vpop.permute.xlu1 %854 }
 0x1c0   :  { %857 = vst.msk [vmem:[#allocation4 + $0x28] sm:$0xff] %vm603_vm7, %v855_v12 }
 0x1c1   :  { %v817_v13 = vpop.permute.xlu0 %816 }
 0x1c2   :  { %819 = vst.msk [vmem:[#allocation4 + $0x20] sm:$0xff] %vm617_vm9, %v817_v13 }
 0x1c3   :  { %v931_v14 = vpop.permute.xlu1 %930 }
 0x1c4   :  { %933 = vst.msk [vmem:[#allocation4 + $0x38] sm:$0xff] %vm575_vm3, %v931_v14  ;;  %vm2615_vm3 = vcmp.lt.s32.totalorder %v556_v38, 64 }
 0x1c5   :  { %v823_v15 = vpop.permute.xlu0 %822 }
 0x1c6   :  { %825 = vst.msk [vmem:[#allocation4 + $0x20] sm:$0xff] %vm624_vm10, %v823_v15 }
 0x1c7   :  { %v861_v16 = vpop.permute.xlu1 %860 }
 0x1c8   :  { %863 = vst.msk [vmem:[#allocation4 + $0x28] sm:$0xff] %vm610_vm8, %v861_v16 }
 0x1c9   :  { %v893_v17 = vpop.permute.xlu0 %892 }
 0x1ca   :  { %895 = vst.msk [vmem:[#allocation4 + $0x30] sm:$0xff] %vm589_vm5, %v893_v17 }
 0x1cb   :  { %v937_v18 = vpop.permute.xlu1 %936 }
 0x1cc   :  { %939 = vst.msk [vmem:[#allocation4 + $0x38] sm:$0xff] %vm582_vm4, %v937_v18  ;;  %vm2779_vm4 = vmand %vm2610_vm2, %vm2615_vm3 }
 0x1cd   :  { %v899_v19 = vpop.permute.xlu0 %898  ;;  %v980_v20 = vld [vmem:[#allocation4 + $0x20] sm:$0xff] }
 0x1ce   :  { %901 = vst.msk [vmem:[#allocation4 + $0x30] sm:$0xff] %vm596_vm6, %v899_v19  ;;  %1797 = vmatprep.mubr.f32.mxu1 %v980_v20 }
 0x1cf   :  { %v867_v21 = vpop.permute.xlu1 %866 }
 0x1d0   :  { %869 = vst.msk [vmem:[#allocation4 + $0x28] sm:$0xff] %vm617_vm9, %v867_v21 }
 0x1d1   :  { %v873_v22 = vpop.permute.xlu0 %872 }
 0x1d2   :  { %875 = vst.msk [vmem:[#allocation4 + $0x28] sm:$0xff] %vm624_vm10, %v873_v22 }
 0x1d3   :  { %v905_v23 = vpop.permute.xlu1 %904 }
 0x1d4   :  { %907 = vst.msk [vmem:[#allocation4 + $0x30] sm:$0xff] %vm603_vm7, %v905_v23 }
 0x1d5   :  { %v949_v25 = vpop.permute.xlu0 %948 }
 0x1d7   :  { %v943_v26 = vpop.permute.xlu1 %942 }
 0x1d8   :  { %945 = vst.msk [vmem:[#allocation4 + $0x38] sm:$0xff] %vm589_vm5, %v943_v26  ;;  %v1364_v26 = vld [vmem:[%s2774_s3 + $0x80] sm:$0xff]  ;;  %vm2634_vm5 = vcmp.ge.s32.totalorder %v556_v38, 64 }
 0x1d9   :  { %951 = vst.msk [vmem:[#allocation4 + $0x38] sm:$0xff] %vm596_vm6, %v949_v25  ;;  %v955_v27 = vpop.permute.xlu0 %954  ;;  %v981_v28 = vld [vmem:[#allocation4 + $0x28] sm:$0xff]  ;;  %vm2639_vm6 = vcmp.lt.s32.totalorder %v556_v38, 80 }
 0x1da   :  { %957 = vst.msk [vmem:[#allocation4 + $0x38] sm:$0xff] %vm603_vm7, %v955_v27  ;;  %1798 = vmatmul.mubr.f32.gmra.mrb[4].mxu1 %v981_v28  ;;  %v1365_v27 = vld [vmem:[%s2774_s3 + $0x88] sm:$0xff]  ;;  %vm2780_vm7 = vmand %vm2634_vm5, %vm2639_vm6 }
 0x1db   :  { %v911_v29 = vpop.permute.xlu1 %910  ;;  %963 = vst.msk [vmem:[#allocation4 + $0x38] sm:$0xff] %vm610_vm8, %v2325_v24  ;;  %v1874_v28 = vpack.c.bf16 %v1365_v27, %v1364_v26  ;;  %v1378_v26 = vld [vmem:[%s2774_s3 + $0xf0] sm:$0xff]  ;;  %v1379_v27 = vld [vmem:[%s2774_s3 + $0xf8] sm:$0xff] }
 0x1dc   :  { %913 = vst.msk [vmem:[#allocation4 + $0x30] sm:$0xff] %vm610_vm8, %v911_v29  ;;  %v1348_v29 = vld [vmem:[%s2774_s3] sm:$0xff]  ;;  %vm2648_vm8 = vcmp.ge.s32.totalorder %v556_v38, 80 }
 0x1dd   :  { %v967_v30 = vpop.permute.xlu0 %966  ;;  %1875 = vmatprep.subr.bf16.mxu1 %v1874_v28 }
 0x1de   :  { %969 = vst.msk [vmem:[#allocation4 + $0x38] sm:$0xff] %vm617_vm9, %v967_v30  ;;  %v1349_v30 = vld [vmem:[%s2774_s3 + $0x8] sm:$0xff] }
 0x1df   :  { %v917_v31 = vpop.permute.xlu1 %916 }
 0x1e0   :  { %919 = vst.msk [vmem:[#allocation4 + $0x30] sm:$0xff] %vm617_vm9, %v917_v31  ;;  %v1366_v31 = vld [vmem:[%s2774_s3 + $0x90] sm:$0xff]  ;;  %vm2653_vm9 = vcmp.lt.s32.totalorder %v556_v38, 96 }
 0x1e3   :  { %v923_v32 = vpop.permute.xlu1 %922 }
 0x1e4   :  { %925 = vst.msk [vmem:[#allocation4 + $0x30] sm:$0xff] %vm624_vm10, %v923_v32 }
 0x1e7   :  { %v973_v33 = vpop.permute.xlu1 %972 }
 0x1e8   :  { %975 = vst.msk [vmem:[#allocation4 + $0x38] sm:$0xff] %vm624_vm10, %v973_v33  ;;  %v1876_v33 = vpack.c.bf16 %v1349_v30, %v1348_v29  ;;  %v1902_v29 = vpack.c.bf16 %v1379_v27, %v1378_v26  ;;  %v1362_v30 = vld [vmem:[%s2774_s3 + $0x70] sm:$0xff]  ;;  %vm2783_vm10 = vmand %vm2648_vm8, %vm2653_vm9 }
 0x1ea   :  { %1877 = vmatpush3.bf16.msra.mxu1 %v1876_v33 }
 0x1eb   :  { %v982_v34 = vld [vmem:[#allocation4 + $0x30] sm:$0xff] }
 0x1ec   :  { %1800 = vmatprep.mubr.f32.mxu1 %v982_v34  ;;  %v1367_v34 = vld [vmem:[%s2774_s3 + $0x98] sm:$0xff] }
 0x1ef   :  { %v983_v36 = vld [vmem:[#allocation4 + $0x38] sm:$0xff] }
 0x1f0   :  { %1801 = vmatmul.mubr.f32.gmra.mrb[6].mxu1 %v983_v36  ;;  %v1350_v36 = vld [vmem:[%s2774_s3 + $0x10] sm:$0xff] }
 0x26d   :  { %v1793_v37 = vpop.f32.mrb[0].mxu1 }
 0x26e   :  { %v1106_v24 = vmax.f32 %v1793_v37, 0.0  ;;  %v1066_v39 = vpop.f32.mrb[1].mxu1  ;;  %v1351_v37 = vld [vmem:[%s2774_s3 + $0x18] sm:$0xff] }
 0x26f   :  { %v1105_v40 = vmax.f32 %v1066_v39, 0.0  ;;  %v1368_v39 = vld [vmem:[%s2774_s3 + $0xa0] sm:$0xff]  ;;  %v1880_v43 = vpack.c.bf16 %v1351_v37, %v1350_v36 }
 0x270   :  { %1114 = vst [vmem:[#allocation5 + $0x8] sm:$0xff] %v1106_v24  ;;  %v1878_v24 = vpack.c.bf16 %v1367_v34, %v1366_v31  ;;  %v1363_v31 = vld [vmem:[%s2774_s3 + $0x78] sm:$0xff]  ;;  %v1463_v37 = vld [vmem:[%s2776_s5] sm:$0xff] }
 0x271   :  { %1113 = vst [vmem:[#allocation5] sm:$0xff] %v1105_v40  ;;  %v1369_v40 = vld [vmem:[%s2774_s3 + $0xa8] sm:$0xff]  ;;  %v1904_v33 = vpack.c.bf16 %v1363_v31, %v1362_v30  ;;  %v1478_v30 = vld [vmem:[%s2776_s5 + $0x78] sm:$0xff] }
 0x272   :  { %1879 = vmatprep.subr.bf16.mxu1 %v1878_v24  ;;  %v1464_v24 = vld [vmem:[%s2776_s5 + $0x8] sm:$0xff] }
 0x273   :  { %1881 = vmatpush3.bf16.msra.mxu1 %v1880_v43  ;;  %v1467_v43 = vld [vmem:[%s2776_s5 + $0x20] sm:$0xff] }
 0x277   :  { %v1125_v45 = vld [vmem:[#allocation5 + $0x8] ss:$2 sm:$0xf]  ;;  %v1127_v46 = vld [vmem:[#allocation5 + $0x9] ss:$2 sm:$0xf] }
 0x278   :  { %v1121_v47 = vld [vmem:[#allocation5] ss:$2 sm:$0xf]  ;;  %v1123_v48 = vld [vmem:[#allocation5 + $0x1] ss:$2 sm:$0xf]  ;;  %v1129_v49 = vmax.f32 %v1125_v45, %v1127_v46  ;;  %v1882_v46 = vpack.c.bf16 %v1369_v40, %v1368_v39  ;;  %v1907_v40 = vpack.c.bf16 %v1464_v24, %v1463_v37 }
 0x279   :  { %v1128_v50 = vmax.f32 %v1121_v47, %v1123_v48  ;;  %v1983_v39 = vmov 0.0|0.0   ;;  %v1479_v24 = vld [vmem:[%s2777_s6] sm:$0x1] }
 0x27a   :  { %1883 = vmatprep.subr.bf16.mxu1 %v1882_v46  ;;  %1906 = vmatprep.subr.bf16.mxu0 %v1983_v39 }
 0x27b   :  { %v1130_v53 = vmax.f32 %v1128_v50, %v1129_v49  ;;  %1908 = vmatpush3.bf16.msra.mxu0 %v1907_v40 }
 0x27c   :  { %1909 = vmatprep.subr.bf16.mxu0 %v1983_v39 }
 0x27d   :  { %v1143_v54 = vrot.slane %v1130_v53, %v2401_v51  ;;  %1135 = vst.msk [vmem:[#allocation6] sm:$0x1] %vm2404_vm11, %v1130_v53  ;;  %v1353_v53 = vld [vmem:[%s2774_s3 + $0x28] sm:$0xff] }
 0x27f   :  { %v1144_v55 = vcombine.high %v1143_v54, %v1143_v54  ;;  %v1151_v57 = vrot.slane %v1143_v54, %v2401_v51  ;;  %v1884_v54 = vpack.c.bf16 %v1353_v53, %v1352_v52  ;;  %v1472_v52 = vld [vmem:[%s2776_s5 + $0x48] sm:$0xff] }
 0x281   :  { %v1158_v56 = vrot.slane %v1144_v55, %v2401_v51  ;;  %v1166_v58 = vcombine.high %v1151_v57, %v1151_v57  ;;  %1885 = vmatpush3.bf16.msra.mxu1 %v1884_v54  ;;  %v1371_v57 = vld [vmem:[%s2774_s3 + $0xb8] sm:$0xff] }
 0x283   :  { %1159 = vrot.lane.b32.xlu0 %v1158_v56, %s1972_s20  ;;  %v1174_v59 = vcombine.high %v1158_v56, %v1158_v56  ;;  %v1370_v56 = vld [vmem:[%s2774_s3 + $0xb0] sm:$0xff] }
 0x287   :  { %1167 = vrot.lane.b32.xlu0 %v1166_v58, %s1975_s8  ;;  %v1886_v58 = vpack.c.bf16 %v1371_v57, %v1370_v56  ;;  %v1473_v56 = vld [vmem:[%s2776_s5 + $0x50] sm:$0xff]  ;;  %v1474_v57 = vld [vmem:[%s2776_s5 + $0x58] sm:$0xff] }
 0x289   :  { %1887 = vmatprep.subr.bf16.mxu1 %v1886_v58  ;;  %v1922_v58 = vpack.c.bf16 %v1474_v57, %v1473_v56 }
 0x28b   :  { %1175 = vrot.lane.b32.xlu0 %v1174_v59, %s1973_s21  ;;  %v1354_v59 = vld [vmem:[%s2774_s3 + $0x30] sm:$0xff] }
 0x28d   :  { %v1796_v60 = vpop.f32.mrb[2].mxu1 }
 0x28e   :  { %v1108_v61 = vmax.f32 %v1796_v60, 0.0  ;;  %v1076_v62 = vpop.f32.mrb[3].mxu1  ;;  %v1355_v60 = vld [vmem:[%s2774_s3 + $0x38] sm:$0xff] }
 0x28f   :  { %v1107_v63 = vmax.f32 %v1076_v62, 0.0 }
 0x290   :  { %1116 = vst [vmem:[#allocation5 + $0x18] sm:$0xff] %v1108_v61  ;;  %v1888_v61 = vpack.c.bf16 %v1355_v60, %v1354_v59 }
 0x291   :  { %1115 = vst [vmem:[#allocation5 + $0x10] sm:$0xff] %v1107_v63 }
 0x292   :  { %1889 = vmatpush3.bf16.msra.mxu1 %v1888_v61  ;;  %v1475_v61 = vld [vmem:[%s2776_s5 + $0x60] sm:$0xff] }
 0x297   :  { %v1187_v0 = vld [vmem:[#allocation5 + $0x18] ss:$2 sm:$0xf]  ;;  %v1189_v1 = vld [vmem:[#allocation5 + $0x19] ss:$2 sm:$0xf] }
 0x298   :  { %v1183_v2 = vld [vmem:[#allocation5 + $0x10] ss:$2 sm:$0xf]  ;;  %v1185_v3 = vld [vmem:[#allocation5 + $0x11] ss:$2 sm:$0xf]  ;;  %v1191_v4 = vmax.f32 %v1187_v0, %v1189_v1 }
 0x299   :  { %v1190_v5 = vmax.f32 %v1183_v2, %v1185_v3 }
 0x29b   :  { %v1192_v6 = vmax.f32 %v1190_v5, %v1191_v4  ;;  %v1372_v4 = vld [vmem:[%s2774_s3 + $0xc0] sm:$0xff]  ;;  %v1373_v5 = vld [vmem:[%s2774_s3 + $0xc8] sm:$0xff] }
 0x29d   :  { %v1200_v7 = vrot.slane %v1192_v6, %v2401_v51  ;;  %v1356_v6 = vld [vmem:[%s2774_s3 + $0x40] sm:$0xff] }
 0x29f   :  { %v1207_v8 = vrot.slane %v1200_v7, %v2401_v51  ;;  %v1215_v9 = vcombine.high %v1200_v7, %v1200_v7  ;;  %v1890_v7 = vpack.c.bf16 %v1373_v5, %v1372_v4 }
 0x2a1   :  { %1208 = vrot.lane.b32.xlu0 %v1207_v8, %s1978_s1  ;;  %v1222_v10 = vrot.slane %v1215_v9, %v2401_v51  ;;  %v1230_v11 = vcombine.high %v1207_v8, %v1207_v8  ;;  %v1357_v8 = vld [vmem:[%s2774_s3 + $0x48] sm:$0xff]  ;;  %1891 = vmatprep.subr.bf16.mxu1 %v1890_v7 }
 0x2a3   :  { %v1238_v12 = vcombine.high %v1222_v10, %v1222_v10 }
 0x2a5   :  { %1223 = vrot.lane.b32.xlu0 %v1222_v10, %s1980_s2  ;;  %v1892_v10 = vpack.c.bf16 %v1357_v8, %v1356_v6  ;;  %v2807_v8 = vmov 0 }
 0x2a6   :  { %v2808_v8 = vsel %vm2653_vm9, 4294967295, %v2807_v8  ;;  %vm2817_vm9 = vmand %vm2565_vm12, %vm2570_vm13 }
 0x2a7   :  { %1893 = vmatpush3.bf16.msra.mxu1 %v1892_v10  ;;  %vm2820_vm12 = vmand %vm2634_vm5, %vm2639_vm6  ;;  %vm2821_vm13 = vnez %v2808_v8 }
 0x2a9   :  { %1231 = vrot.lane.b32.xlu0 %v1230_v11, %s1981_s0  ;;  %v1374_v11 = vld [vmem:[%s2774_s3 + $0xd0] sm:$0xff] }
 0x2ad   :  { %v1799_v13 = vpop.f32.mrb[4].mxu1  ;;  %1239 = vrot.lane.b32.xlu0 %v1238_v12, %s1982_s26  ;;  %v1375_v12 = vld [vmem:[%s2774_s3 + $0xd8] sm:$0xff] }
 0x2ae   :  { %v1110_v14 = vmax.f32 %v1799_v13, 0.0  ;;  %v1086_v15 = vpop.f32.mrb[5].mxu1 }
 0x2af   :  { %v1109_v16 = vmax.f32 %v1086_v15, 0.0  ;;  %v1358_v15 = vld [vmem:[%s2774_s3 + $0x50] sm:$0xff] }
 0x2b0   :  { %1118 = vst [vmem:[#allocation5 + $0x28] sm:$0xff] %v1110_v14  ;;  %v1894_v14 = vpack.c.bf16 %v1375_v12, %v1374_v11 }
 0x2b1   :  { %1117 = vst [vmem:[#allocation5 + $0x20] sm:$0xff] %v1109_v16  ;;  %v1359_v16 = vld [vmem:[%s2774_s3 + $0x58] sm:$0xff] }
 0x2b2   :  { %1895 = vmatprep.subr.bf16.mxu1 %v1894_v14 }
 0x2b7   :  { %v1251_v17 = vld [vmem:[#allocation5 + $0x28] ss:$2 sm:$0xf]  ;;  %v1253_v18 = vld [vmem:[#allocation5 + $0x29] ss:$2 sm:$0xf] }
 0x2b8   :  { %v1247_v19 = vld [vmem:[#allocation5 + $0x20] ss:$2 sm:$0xf]  ;;  %v1249_v20 = vld [vmem:[#allocation5 + $0x21] ss:$2 sm:$0xf]  ;;  %v1255_v21 = vmax.f32 %v1251_v17, %v1253_v18  ;;  %v1896_v17 = vpack.c.bf16 %v1359_v16, %v1358_v15 }
 0x2b9   :  { %v1254_v22 = vmax.f32 %v1247_v19, %v1249_v20  ;;  %v1376_v20 = vld [vmem:[%s2774_s3 + $0xe0] sm:$0xff] }
 0x2ba   :  { %1897 = vmatpush3.bf16.msra.mxu1 %v1896_v17 }
 0x2bb   :  { %v1256_v23 = vmax.f32 %v1254_v22, %v1255_v21  ;;  %v1377_v21 = vld [vmem:[%s2774_s3 + $0xe8] sm:$0xff]  ;;  %v1360_v22 = vld [vmem:[%s2774_s3 + $0x60] sm:$0xff] }
 0x2bd   :  { %v1265_v25 = vrot.slane %v1256_v23, %v2401_v51  ;;  %1257 = vst.msk [vmem:[#allocation6 + $0x1] sm:$0x1] %vm2404_vm11, %v1256_v23  ;;  %v1898_v23 = vpack.c.bf16 %v1377_v21, %v1376_v20  ;;  %vm2667_vm11 = vcmp.ge.s32.totalorder %v556_v38, 96 }
 0x2bf   :  { %v1266_v32 = vcombine.high %v1265_v25, %v1265_v25  ;;  %v1273_v42 = vrot.slane %v1265_v25, %v2401_v51  ;;  %v1361_v25 = vld [vmem:[%s2774_s3 + $0x68] sm:$0xff]  ;;  %1899 = vmatprep.subr.bf16.mxu1 %v1898_v23  ;;  %v1384_v23 = vsub.s32 0, %v2398_v44 }
 0x2c0   :  { %v1900_v28 = vpack.c.bf16 %v1361_v25, %v1360_v22  ;;  %v1388_v25 = vsub.s32 1, %v2398_v44  ;;  %v1380_v44 = vld [vmem:[%s2775_s4] sm:$0x1] }
 0x2c1   :  { %v1280_v41 = vrot.slane %v1266_v32, %v2401_v51  ;;  %v1285_v50 = vcombine.high %v1273_v42, %v1273_v42 }
 0x2c2   :  { %1901 = vmatpush3.bf16.msra.mxu1 %v1900_v28 }
 0x2c3   :  { %v1802_v45 = vpop.f32.mrb[6].mxu1  ;;  %1281 = vrot.lane.b32.xlu1 %v1280_v41, %s1972_s20  ;;  %v1290_v55 = vcombine.high %v1280_v41, %v1280_v41  ;;  %1903 = vmatprep.subr.bf16.mxu1 %v1902_v29  ;;  %v1466_v41 = vld [vmem:[%s2776_s5 + $0x18] sm:$0xff]  ;;  %v1477_v29 = vld [vmem:[%s2776_s5 + $0x70] sm:$0xff] }
 0x2c4   :  { %v1112_v47 = vmax.f32 %v1802_v45, 0.0  ;;  %v1096_v48 = vpop.f32.mrb[7].mxu1  ;;  %v1468_v45 = vld [vmem:[%s2776_s5 + $0x28] sm:$0xff]  ;;  %v1928_v31 = vpack.c.bf16 %v1478_v30, %v1477_v29 }
 0x2c5   :  { %v1111_v49 = vmax.f32 %v1096_v48, 0.0  ;;  %v1913_v46 = vpack.c.bf16 %v1468_v45, %v1467_v43  ;;  %v1470_v48 = vld [vmem:[%s2776_s5 + $0x38] sm:$0xff] }
 0x2c6   :  { %1120 = vst [vmem:[#allocation5 + $0x38] sm:$0xff] %v1112_v47  ;;  %1905 = vmatpush3.bf16.msra.mxu1 %v1904_v33  ;;  %v1469_v47 = vld [vmem:[%s2776_s5 + $0x30] sm:$0xff] }
 0x2c7   :  { %1119 = vst [vmem:[#allocation5 + $0x30] sm:$0xff] %v1111_v49  ;;  %1286 = vrot.lane.b32.xlu1 %v1285_v50, %s1975_s8  ;;  %v1916_v49 = vpack.c.bf16 %v1470_v48, %v1469_v47  ;;  %v1471_v50 = vld [vmem:[%s2776_s5 + $0x40] sm:$0xff] }
 0x2c8   :  { %v1919_v53 = vpack.c.bf16 %v1472_v52, %v1471_v50 }
 0x2cb   :  { %1291 = vrot.lane.b32.xlu1 %v1290_v55, %s1973_s21 }
 0x2cd   :  { %v1300_v62 = vld [vmem:[#allocation5 + $0x38] ss:$2 sm:$0xf]  ;;  %v1302_v63 = vld [vmem:[#allocation5 + $0x39] ss:$2 sm:$0xf] }
 0x2ce   :  { %v1296_v0 = vld [vmem:[#allocation5 + $0x30] ss:$2 sm:$0xf]  ;;  %v1298_v1 = vld [vmem:[#allocation5 + $0x31] ss:$2 sm:$0xf]  ;;  %v1304_v2 = vmax.f32 %v1300_v62, %v1302_v63 }
 0x2cf   :  { %v1303_v3 = vmax.f32 %v1296_v0, %v1298_v1  ;;  %v1476_v62 = vld [vmem:[%s2776_s5 + $0x68] sm:$0xff] }
 0x2d0   :  { %v1925_v0 = vpack.c.bf16 %v1476_v62, %v1475_v61 }
 0x2d1   :  { %v1305_v9 = vmax.f32 %v1303_v3, %v1304_v2 }
 0x2d3   :  { %v1313_v13 = vrot.slane %v1305_v9, %v2401_v51 }
 0x2d5   :  { %v1320_v18 = vrot.slane %v1313_v13, %v2401_v51  ;;  %v1325_v19 = vcombine.high %v1313_v13, %v1313_v13 }
 0x2d7   :  { %1321 = vrot.lane.b32.xlu1 %v1320_v18, %s1978_s1  ;;  %v1332_v32 = vrot.slane %v1325_v19, %v2401_v51  ;;  %v1337_v34 = vcombine.high %v1320_v18, %v1320_v18  ;;  %v1465_v51 = vld [vmem:[%s2776_s5 + $0x10] sm:$0xff]  ;;  %s1985_s5 = smov [#allocation7]  }
 0x2d8   :  { %v1910_v42 = vpack.c.bf16 %v1466_v41, %v1465_v51  ;;  %s1557_s22 = sshll.u32 %s1985_s5, 4  ;;  %s1558_s22 = int_to_ptr.vmem [resolvable:$true] %s1557_s22 }
 0x2d9   :  { %v1342_v36 = vcombine.high %v1332_v32, %v1332_v32  ;;  %s1946_s23 = scalar_lea.vmem %s1558_s22, 16  ;;  %s1950_s24 = scalar_lea.vmem %s1558_s22, 32 }
 0x2da   :  { %1911 = vmatpush3.bf16.msra.mxu0 %v1910_v42  ;;  %p1947_p0 = scmp.ne.s32.totalorder %s1558_s22, %s1946_s23  ;;  %p1951_p1 = scmp.lt.s32.totalorder %s1558_s22, %s1558_s22 }
 0x2db   :  { %1333 = vrot.lane.b32.xlu1 %v1332_v32, %s1980_s2  ;;  %1912 = vmatprep.subr.bf16.mxu0 %v1983_v39  ;;  %p1952_p2 = scmp.lt.s32.totalorder %s1950_s24, %s1946_s23 }
 0x2dd   :  { %p1953_p3 = por %p1952_p2, %p1951_p1 }
 0x2de   :  { %1914 = vmatpush3.bf16.msra.mxu0 %v1913_v46 }
 0x2df   :  { %1338 = vrot.lane.b32.xlu1 %v1337_v34, %s1981_s0  ;;  %1915 = vmatprep.subr.bf16.mxu0 %v1983_v39  ;;  %p1954_p4 = pnand %p1953_p3, %p1947_p0 }
 0x2e2   :  { %1917 = vmatpush3.bf16.msra.mxu0 %v1916_v49 }
 0x2e3   :  { %1343 = vrot.lane.b32.xlu1 %v1342_v36, %s1982_s26  ;;  %1918 = vmatprep.subr.bf16.mxu0 %v1983_v39 }
 0x2e6   :  { %1920 = vmatpush3.bf16.msra.mxu0 %v1919_v53 }
 0x2e7   :  { %1921 = vmatprep.subr.bf16.mxu0 %v1983_v39 }
 0x2ea   :  { %1923 = vmatpush3.bf16.msra.mxu0 %v1922_v58 }
 0x2eb   :  { %1924 = vmatprep.subr.bf16.mxu0 %v1983_v39 }
 0x2ee   :  { %1926 = vmatpush3.bf16.msra.mxu0 %v1925_v0 }
 0x2ef   :  { %1927 = vmatprep.subr.bf16.mxu0 %v1983_v39 }
 0x2f2   :  { %1929 = vmatpush3.bf16.msra.mxu0 %v1928_v31 }
 0x2f5   :  { %v1160_v63 = vpop.permute.xlu0 %1159 }
 0x2f6   :  { %1165 = vst.msk [vmem:[#allocation6] sm:$0x1] %vm2782_vm14, %v1160_v63  ;;  %vm2691_vm14 = vcmp.lt.s32.totalorder %v556_v38, 128 }
 0x2f9   :  { %v1168_v3 = vpop.permute.xlu0 %1167 }
 0x2fa   :  { %1173 = vst.msk [vmem:[#allocation6] sm:$0x1] %vm2781_vm1, %v1168_v3  ;;  %vm2686_vm1 = vcmp.ge.s32.totalorder %v556_v38, 112 }
 0x2fd   :  { %v1176_v4 = vpop.permute.xlu0 %1175 }
 0x2fe   :  { %1181 = vst.msk [vmem:[#allocation6] sm:$0x1] %vm2779_vm4, %v1176_v4  ;;  %vm2672_vm4 = vcmp.lt.s32.totalorder %v556_v38, 112 }
 0x313   :  { %v1209_v9 = vpop.permute.xlu0 %1208 }
 0x314   :  { %1214 = vst.msk [vmem:[#allocation6] sm:$0x1] %vm2780_vm7, %v1209_v9  ;;  %vm2785_vm7 = vmand %vm2667_vm11, %vm2672_vm4 }
 0x317   :  { %v1224_v12 = vpop.permute.xlu0 %1223 }
 0x318   :  { %1229 = vst.msk [vmem:[#allocation6] sm:$0x1] %vm2783_vm10, %v1224_v12  ;;  %vm2786_vm10 = vmand %vm2686_vm1, %vm2691_vm14 }
 0x31b   :  { %v1232_v15 = vpop.permute.xlu0 %1231 }
 0x31c   :  { %1237 = vst.msk [vmem:[#allocation6] sm:$0x1] %vm2785_vm7, %v1232_v15  ;;  %vm2818_vm7 = vmand %vm2585_vm15, %vm2590_vm0 }
 0x31d   :  { %vm2822_vm15 = vmand %vm2648_vm8, %vm2821_vm13 }
 0x31e   :  { %vm2823_vm0 = vmand %vm2667_vm11, %vm2672_vm4 }
 0x31f   :  { %v1240_v16 = vpop.permute.xlu0 %1239 }
 0x320   :  { %1245 = vst.msk [vmem:[#allocation6] sm:$0x1] %vm2786_vm10, %v1240_v16  ;;  %vm2819_vm10 = vmand %vm2610_vm2, %vm2615_vm3 }
 0x321   :  { %vm2824_vm2 = vmand %vm2686_vm1, %vm2691_vm14  ;;  %vm1984_vm14 = vmmov 0  }
 0x322   :  { %1835 = vmatprep.mubr.msk.f32.mxu0 %vm1984_vm14, %v1970_v35 }
 0x335   :  { %v1282_v38 = vpop.permute.xlu1 %1281 }
 0x336   :  { %1284 = vst.msk [vmem:[#allocation6 + $0x1] sm:$0x1] %vm2817_vm9, %v1282_v38 }
 0x339   :  { %v1287_v17 = vpop.permute.xlu1 %1286 }
 0x33a   :  { %1289 = vst.msk [vmem:[#allocation6 + $0x1] sm:$0x1] %vm2818_vm7, %v1287_v17 }
 0x33d   :  { %v1292_v18 = vpop.permute.xlu1 %1291 }
 0x33e   :  { %1294 = vst.msk [vmem:[#allocation6 + $0x1] sm:$0x1] %vm2819_vm10, %v1292_v18 }
 0x349   :  { %v1322_v19 = vpop.permute.xlu1 %1321 }
 0x34a   :  { %1324 = vst.msk [vmem:[#allocation6 + $0x1] sm:$0x1] %vm2820_vm12, %v1322_v19 }
 0x34d   :  { %v1334_v20 = vpop.permute.xlu1 %1333 }
 0x34e   :  { %1336 = vst.msk [vmem:[#allocation6 + $0x1] sm:$0x1] %vm2822_vm15, %v1334_v20 }
 0x351   :  { %v1339_v21 = vpop.permute.xlu1 %1338 }
 0x352   :  { %1341 = vst.msk [vmem:[#allocation6 + $0x1] sm:$0x1] %vm2823_vm0, %v1339_v21 }
 0x355   :  { %v1344_v22 = vpop.permute.xlu1 %1343 }
 0x356   :  { %1346 = vst.msk [vmem:[#allocation6 + $0x1] sm:$0x1] %vm2824_vm2, %v1344_v22 }
 0x35d   :  { %v1347_v26 = vld [vmem:[#allocation6] sm:$0x3] }
 0x35e   :  { %v1385_v27 = vrot.slane %v1347_v26, %v1384_v23  ;;  %v1389_v28 = vrot.slane %v1347_v26, %v1388_v25 }
 0x360   :  { %1456 = vmatprep.mubr.f32.mxu1 %v1389_v28 }
 0x361   :  { %1457 = vmatmul.mubr.f32.vlgmr.msra.gmra.mrb[8].mxu1 %v1385_v27 }
 0x434   :  { %v1687_v32 = vpop.f32.mrb[8].mxu1 }
 0x435   :  { %v1688_v33 = vpop.f32.mrb[9].mxu1 }
 0x436   :  { %v1689_v34 = vadd.f32 %v1688_v33, %v1687_v32 }
 0x438   :  { %v1459_v36 = vadd.f32 %v1689_v34, %v1380_v44 }
 0x43a   :  { %v1462_v37 = vmax.f32 %v1459_v36, 0.0 }
 0x43c   :  { %1836 = vmatmul.mubr.f32.vlgmr.msra.gmra.mrb[32].mxu0 %v1462_v37 }
 0x50f   :  { %v1546_v51 = vpop.f32.mrb[32].mxu0 }
 0x510   :  { %v1547_v39 = vadd.f32 %v1546_v51, %v1479_v24  ;;  %v1837_v40 = vpop.f32.mrb[33].mxu0 }
 0x512   :  { %1550 = vst [vmem:[#allocation7] sm:$0x1] %v1547_v39 }
 0x513   :  { %1957 = shalt.err (!%p1954_p4)
}
 0x514   :  { %s1958_s27 = scalar_lea.hbm %s2778_s7, 16 }
 0x515   :  { %p1959_p5 = scmp.ne.s32.totalorder %s2778_s7, %s1958_s27  ;;  %p1962_p6 = scmp.lt.u32.totalorder %s1958_s27, %s2778_s7 }
 0x517   :  { %p1964_p7 = pnand %p1962_p6, %p1959_p5 }
 0x519   :  { %1967 = shalt.err (!%p1964_p7)
}
 0x51a   :  { %1560 = dma.vmem_to_hbm [thread:$0]  %s1558_s22, 16, %s2778_s7, [#allocation8]  }
 0x51b   :  { %1968 = dma.done.wait [#allocation8], 16  }
 0x51c   :  { %1969 = vsyncadd [#allocation8], 4294967280 }
 0x51d   :  { %1564 = vsyncpa [#allocation8], 1 }

</bundles_post_ra>
